<compile_context>
chip_gen: v6e
topology: v6e:2x2x1
jax: 0.10.0
libtpu: 0.0.40
codegen_flags: <defaults>
</compile_context>

<pallas_src>
import numpy as np
import jax
import jax.numpy as jnp
from jax.experimental import pallas as pl
from jax.experimental.pallas import tpu as pltpu

H_IN, W_IN = 6, 7                     # 6x7 board, 1 channel (NCHW input (B,1,6,7))
K = 3                                 # conv kernel size
C1, C2 = 32, 64                       # conv channel counts
OH1, OW1 = H_IN - K + 1, W_IN - K + 1 # 4, 5
OH2, OW2 = OH1 - K + 1, OW1 - K + 1   # 2, 3
P1 = OH1 * OW1                        # 20 conv1 output positions
P2 = OH2 * OW2                        # 6  conv2 output positions
N_PIX = H_IN * W_IN                   # 42
N1 = P1 * C1                          # 640  (conv1 activations, flattened)
FLAT = C2 * P2                        # 384  (= fc1.in_features, PyTorch CHW flatten)
HIDDEN = 256
ACTION_SIZE = 7
OUT_PAD = 128                         # lane-padded logits / probs width


# --------------------------------------------------------------------------- kernel
def actor_kernel(x_ref, m1_ref, b1_ref, m2_ref, b2_ref,
                 wf1_ref, bf1_ref, wf2_ref, bf2_ref, wo_ref, bo_ref, out_ref):
    # conv1 as one dense matmul (host-folded), then bias + ReLU in f32
    x = x_ref[...]                                                          # (Bt, 42) bf16
    h1 = jnp.dot(x, m1_ref[...], preferred_element_type=jnp.float32) + b1_ref[...]
    h1 = jnp.maximum(h1, 0.0).astype(jnp.bfloat16)                          # (Bt, 640)

    # conv2 as one dense matmul; output already in PyTorch CHW flatten order
    h2 = jnp.dot(h1, m2_ref[...], preferred_element_type=jnp.float32) + b2_ref[...]
    h2 = jnp.maximum(h2, 0.0).astype(jnp.bfloat16)                          # (Bt, 384)

    # fc1 / fc2
    f1 = jnp.dot(h2, wf1_ref[...], preferred_element_type=jnp.float32) + bf1_ref[...]
    f1 = jnp.maximum(f1, 0.0).astype(jnp.bfloat16)                          # (Bt, 256)
    f2 = jnp.dot(f1, wf2_ref[...], preferred_element_type=jnp.float32) + bf2_ref[...]
    f2 = jnp.maximum(f2, 0.0).astype(jnp.bfloat16)                          # (Bt, 256)

    # actor head (lane-padded to 128; pad bias = -1e30 => exp underflows to 0)
    logits = jnp.dot(f2, wo_ref[...], preferred_element_type=jnp.float32) + bo_ref[...]
    m = jnp.max(logits, axis=-1, keepdims=True)
    e = jnp.exp(logits - m)
    denom = jnp.sum(e, axis=-1, keepdims=True)
    out_ref[...] = e / denom                                                # exact normalize


# ------------------------------------------------------------------- host precompute
def _build_selection_matrices():
    """0/1 im2col gather matrices (numpy, host-only)."""
    sel1 = np.zeros((K * K, P1, N_PIX), np.float32)
    for dh in range(K):
        for dw in range(K):
            k = dh * K + dw
            for oh in range(OH1):
                for ow in range(OW1):
                    sel1[k, oh * OW1 + ow, (oh + dh) * W_IN + (ow + dw)] = 1.0
    sel2 = np.zeros((K * K, P2, P1), np.float32)
    for dh in range(K):
        for dw in range(K):
            k = dh * K + dw
            for oh in range(OH2):
                for ow in range(OW2):
                    sel2[k, oh * OW2 + ow, (oh + dh) * OW1 + (ow + dw)] = 1.0
    return sel1, sel2


def init_params(key):
    """Deterministic synthetic parameters in PyTorch layouts."""
    ks = jax.random.split(key, 10)
    s = 0.1
    return {
        "Wc1": jax.random.normal(ks[0], (C1, 1, K, K), jnp.float32) * s,
        "bc1": jax.random.normal(ks[1], (C1,), jnp.float32) * s,
        "Wc2": jax.random.normal(ks[2], (C2, C1, K, K), jnp.float32) * s,
        "bc2": jax.random.normal(ks[3], (C2,), jnp.float32) * s,
        "Wf1": jax.random.normal(ks[4], (HIDDEN, FLAT), jnp.float32) * s,
        "bf1": jax.random.normal(ks[5], (HIDDEN,), jnp.float32) * s,
        "Wf2": jax.random.normal(ks[6], (HIDDEN, HIDDEN), jnp.float32) * s,
        "bf2": jax.random.normal(ks[7], (HIDDEN,), jnp.float32) * s,
        "Wo": jax.random.normal(ks[8], (ACTION_SIZE, HIDDEN), jnp.float32) * s,
        "bo": jax.random.normal(ks[9], (ACTION_SIZE,), jnp.float32) * s,
    }


def kernel_weights(p):
    """Fold convs + PyTorch flatten order into dense matrices (exact, f32 on host);
    matmul weights stored as bf16, biases kept f32."""
    sel1, sel2 = _build_selection_matrices()
    Wc1 = np.asarray(p["Wc1"], np.float32)
    Wc2 = np.asarray(p["Wc2"], np.float32)

    # conv1: M1[h*W+w, p*C1+c] = Wc1[c,0,dh,dw] where (h,w) = (oh+dh, ow+dw), p = oh*OW1+ow
    w1 = Wc1[:, 0].transpose(1, 2, 0).reshape(K * K, C1)                 # (9, C1)
    M1 = np.einsum("kpx,kc->xpc", sel1, w1).reshape(N_PIX, N1)           # (42, 640)
    b1 = np.broadcast_to(np.asarray(p["bc1"], np.float32), (P1, C1)).reshape(1, N1)

    # conv2: M2[p1*C1+c1, c2*P2+p2] = Wc2[c2,c1,dh,dw]  (output = PyTorch CHW flatten)
    w2 = Wc2.transpose(2, 3, 1, 0).reshape(K * K, C1, C2)                # (9, C1, C2)
    M2 = np.einsum("kqp,kcd->pcdq", sel2, w2).reshape(N1, FLAT)          # (640, 384)
    b2 = np.broadcast_to(np.asarray(p["bc2"], np.float32)[:, None], (C2, P2)).reshape(1, FLAT)

    # actor head, lane-padded to 128: zero weight cols / -1e30 bias on the padding
    Wo_pad = np.zeros((HIDDEN, OUT_PAD), np.float32)
    Wo_pad[:, :ACTION_SIZE] = np.asarray(p["Wo"], np.float32).T
    bo_pad = np.full((1, OUT_PAD), -1e30, np.float32)
    bo_pad[0, :ACTION_SIZE] = np.asarray(p["bo"], np.float32)

    return dict(
        m1=jnp.asarray(M1, jnp.bfloat16), b1=jnp.asarray(b1, jnp.float32),
        m2=jnp.asarray(M2, jnp.bfloat16), b2=jnp.asarray(b2, jnp.float32),
        wf1=jnp.asarray(np.asarray(p["Wf1"], np.float32).T, jnp.bfloat16),
        bf1=jnp.asarray(p["bf1"], jnp.float32).reshape(1, HIDDEN),
        wf2=jnp.asarray(np.asarray(p["Wf2"], np.float32).T, jnp.bfloat16),
        bf2=jnp.asarray(p["bf2"], jnp.float32).reshape(1, HIDDEN),
        wo=jnp.asarray(Wo_pad, jnp.bfloat16), bo=jnp.asarray(bo_pad, jnp.float32),
    )


# ------------------------------------------------------------------------- wrapper
def _round_up(x, m):
    return ((x + m - 1) // m) * m


def conv_actor_forward(x_nchw, kw, *, block_b=None):
    """Batched forward: x_nchw (B,1,6,7) -> action probabilities (B, ACTION_SIZE)."""
    B = x_nchw.shape[0]
    if block_b is None:
        # Small batches: one fat grid step (no per-step overhead).
        # Large batches: 256-row tiles; the "parallel" batch axis lets v7x's
        # two TensorCores split the steps.  Multiple of 8 for sublane tiling.
        block_b = min(256, _round_up(B, 8))
    block_b = max(8, _round_up(block_b, 8))
    nb = (B + block_b - 1) // block_b
    b_pad = nb * block_b

    # Host-side bf16 cast: halves the only per-step streaming DMA (boards),
    # exact for {-1,0,1}-style board encodings.
    xflat = x_nchw.reshape(B, N_PIX).astype(jnp.bfloat16)      # row-major (H,W) flatten
    if b_pad != B:
        xflat = jnp.pad(xflat, ((0, b_pad - B), (0, 0)))

    # Advisory cost estimate so XLA treats the call as compute-heavy.
    mm_elems = N_PIX * N1 + N1 * FLAT + FLAT * HIDDEN + HIDDEN * HIDDEN + HIDDEN * OUT_PAD
    weight_bytes = 2 * mm_elems + 4 * (N1 + FLAT + HIDDEN + HIDDEN + OUT_PAD)
    cost = pl.CostEstimate(
        flops=2 * mm_elems * b_pad,
        transcendentals=OUT_PAD * b_pad,
        bytes_accessed=weight_bytes + b_pad * (N_PIX * 2 + OUT_PAD * 4),
    )

    full = lambda i: (0, 0)   # weights: constant block -> stay resident across grid steps
    out = pl.pallas_call(
        actor_kernel,
        out_shape=jax.ShapeDtypeStruct((b_pad, OUT_PAD), jnp.float32),
        grid=(nb,),
        in_specs=[
            pl.BlockSpec((block_b, N_PIX), lambda i: (i, 0)),     # boards (streamed)
            pl.BlockSpec((N_PIX, N1), full),                      # M1
            pl.BlockSpec((1, N1), full),                          # b1
            pl.BlockSpec((N1, FLAT), full),                       # M2
            pl.BlockSpec((1, FLAT), full),                        # b2
            pl.BlockSpec((FLAT, HIDDEN), full),                   # Wf1
            pl.BlockSpec((1, HIDDEN), full),                      # bf1
            pl.BlockSpec((HIDDEN, HIDDEN), full),                 # Wf2
            pl.BlockSpec((1, HIDDEN), full),                      # bf2
            pl.BlockSpec((HIDDEN, OUT_PAD), full),                # Wo (padded)
            pl.BlockSpec((1, OUT_PAD), full),                     # bo (padded)
        ],
        out_specs=pl.BlockSpec((block_b, OUT_PAD), lambda i: (i, 0)),
        compiler_params=pltpu.CompilerParams(
            dimension_semantics=("parallel",)),                   # shard batch across TCs (v7x)
        cost_estimate=cost,
    )(xflat, kw["m1"], kw["b1"], kw["m2"], kw["b2"],
      kw["wf1"], kw["bf1"], kw["wf2"], kw["bf2"], kw["wo"], kw["bo"])
    return out[:B, :ACTION_SIZE]


# ----------------------------------------------------------------------- reference
def torch_reference_forward(x_nchw, p):
    """Pure-JAX mirror of the PyTorch module for ONE board (NCHW convs, CHW flatten,
    x@W.T+b linears, softmax over dim 0)."""
    dn = ("NCHW", "OIHW", "NCHW")
    h = jax.lax.conv_general_dilated(x_nchw, p["Wc1"], (1, 1), "VALID", dimension_numbers=dn)
    h = jax.nn.relu(h + p["bc1"].reshape(1, C1, 1, 1))
    h = jax.lax.conv_general_dilated(h, p["Wc2"], (1, 1), "VALID", dimension_numbers=dn)
    h = jax.nn.relu(h + p["bc2"].reshape(1, C2, 1, 1))
    flat = h.reshape(-1)                                   # Flatten(start_dim=0) -> (384,)
    h = jax.nn.relu(p["Wf1"] @ flat + p["bf1"])
    h = jax.nn.relu(p["Wf2"] @ h + p["bf2"])
    logits = p["Wo"] @ h + p["bo"]
    return jax.nn.softmax(logits, axis=0)


if __name__ == "__main__":
    key = jax.random.PRNGKey(0)
    pkey, xkey = jax.random.split(key)

    params = init_params(pkey)
    kw = kernel_weights(params)

    # Small batch of 6x7 one-channel boards (each row = one module forward pass).
    B = 16
    x = jax.random.normal(xkey, (B, 1, H_IN, W_IN), jnp.float32)

    # Default path: single fat grid step (block_b = padded B).
    probs = conv_actor_forward(x, kw)
    probs = jax.block_until_ready(probs)

    ref = jnp.stack([torch_reference_forward(x[i:i + 1], params) for i in range(B)])
    # bf16 matmul operands => loosened tolerances vs. pure f32
    np.testing.assert_allclose(np.asarray(probs), np.asarray(ref), rtol=5e-2, atol=5e-3)
    assert probs.shape == (B, ACTION_SIZE)
    row_sums = np.asarray(jnp.sum(probs, axis=-1))
    assert np.all(np.abs(row_sums - 1.0) < 1e-3)          # exact normalize in-kernel

    # Multi-step / padded-batch path (odd batch, explicit small tile -> 2 grid steps).
    probs_tiled = jax.block_until_ready(conv_actor_forward(x[:13], kw, block_b=8))
    np.testing.assert_allclose(np.asarray(probs_tiled), np.asarray(ref[:13]),
                               rtol=5e-2, atol=5e-3)

    print("KERNEL_OK")
</pallas_src>

<mosaic_0001>
module attributes {stable_mosaic.version = 11 : i64} {
  func.func @actor_kernel(%arg0: i32, %arg1: memref<16x42xbf16, #tpu.memory_space<vmem>>, %arg2: memref<42x640xbf16, #tpu.memory_space<vmem>>, %arg3: memref<1x640xf32, #tpu.memory_space<vmem>>, %arg4: memref<640x384xbf16, #tpu.memory_space<vmem>>, %arg5: memref<1x384xf32, #tpu.memory_space<vmem>>, %arg6: memref<384x256xbf16, #tpu.memory_space<vmem>>, %arg7: memref<1x256xf32, #tpu.memory_space<vmem>>, %arg8: memref<256x256xbf16, #tpu.memory_space<vmem>>, %arg9: memref<1x256xf32, #tpu.memory_space<vmem>>, %arg10: memref<256x128xbf16, #tpu.memory_space<vmem>>, %arg11: memref<1x128xf32, #tpu.memory_space<vmem>>, %arg12: memref<16x128xf32, #tpu.memory_space<vmem>>) attributes {dimension_semantics = [#tpu.dimension_semantics<parallel>], iteration_bounds = array<i64: 1>, scalar_prefetch = 0 : i64, scratch_operands = 0 : i64, tpu.core_type = #tpu.core_type<tc>, window_params = [{transform_indices = @transform_0, window_bounds = array<i64: 16, 42>}, {pipeline_mode = #tpu.pipeline_mode<synchronous>, transform_indices = @transform_1, window_bounds = array<i64: 42, 640>}, {pipeline_mode = #tpu.pipeline_mode<synchronous>, transform_indices = @transform_2, window_bounds = array<i64: 1, 640>}, {pipeline_mode = #tpu.pipeline_mode<synchronous>, transform_indices = @transform_3, window_bounds = array<i64: 640, 384>}, {pipeline_mode = #tpu.pipeline_mode<synchronous>, transform_indices = @transform_4, window_bounds = array<i64: 1, 384>}, {pipeline_mode = #tpu.pipeline_mode<synchronous>, transform_indices = @transform_5, window_bounds = array<i64: 384, 256>}, {pipeline_mode = #tpu.pipeline_mode<synchronous>, transform_indices = @transform_6, window_bounds = array<i64: 1, 256>}, {pipeline_mode = #tpu.pipeline_mode<synchronous>, transform_indices = @transform_7, window_bounds = array<i64: 256, 256>}, {pipeline_mode = #tpu.pipeline_mode<synchronous>, transform_indices = @transform_8, window_bounds = array<i64: 1, 256>}, {pipeline_mode = #tpu.pipeline_mode<synchronous>, transform_indices = @transform_9, window_bounds = array<i64: 256, 128>}, {pipeline_mode = #tpu.pipeline_mode<synchronous>, transform_indices = @transform_10, window_bounds = array<i64: 1, 128>}, {transform_indices = @transform_11, window_bounds = array<i64: 16, 128>}]} {
    %c0 = arith.constant 0 : index
    %c0_0 = arith.constant 0 : index
    %0 = vector.load %arg1[%c0, %c0_0] : memref<16x42xbf16, #tpu.memory_space<vmem>>, vector<16x42xbf16>
    %c0_1 = arith.constant 0 : index
    %c0_2 = arith.constant 0 : index
    %1 = vector.load %arg2[%c0_1, %c0_2] : memref<42x640xbf16, #tpu.memory_space<vmem>>, vector<42x640xbf16>
    %cst = arith.constant dense<0.000000e+00> : vector<16x640xf32>
    %2 = tpu.matmul %0, %1, %cst {dimension_numbers = #tpu.dot_dimension_numbers<[1], [0], [0], [1], [0, 0, 1, 1], [], []>} : vector<16x42xbf16>, vector<42x640xbf16>, vector<16x640xf32> -> vector<16x640xf32>
    %c0_3 = arith.constant 0 : index
    %c0_4 = arith.constant 0 : index
    %3 = vector.load %arg3[%c0_3, %c0_4] : memref<1x640xf32, #tpu.memory_space<vmem>>, vector<1x640xf32>
    %4 = vector.broadcast %3 : vector<1x640xf32> to vector<16x640xf32>
    %5 = arith.addf %2, %4 : vector<16x640xf32>
    %cst_5 = arith.constant 0.000000e+00 : f32
    %6 = vector.broadcast %cst_5 : f32 to vector<16x640xf32>
    %7 = arith.maximumf %5, %6 : vector<16x640xf32>
    %8 = arith.truncf %7 : vector<16x640xf32> to vector<16x640xbf16>
    %c0_6 = arith.constant 0 : index
    %c0_7 = arith.constant 0 : index
    %9 = vector.load %arg4[%c0_6, %c0_7] : memref<640x384xbf16, #tpu.memory_space<vmem>>, vector<640x384xbf16>
    %cst_8 = arith.constant dense<0.000000e+00> : vector<16x384xf32>
    %10 = tpu.matmul %8, %9, %cst_8 {dimension_numbers = #tpu.dot_dimension_numbers<[1], [0], [0], [1], [0, 0, 1, 1], [], []>} : vector<16x640xbf16>, vector<640x384xbf16>, vector<16x384xf32> -> vector<16x384xf32>
    %c0_9 = arith.constant 0 : index
    %c0_10 = arith.constant 0 : index
    %11 = vector.load %arg5[%c0_9, %c0_10] : memref<1x384xf32, #tpu.memory_space<vmem>>, vector<1x384xf32>
    %12 = vector.broadcast %11 : vector<1x384xf32> to vector<16x384xf32>
    %13 = arith.addf %10, %12 : vector<16x384xf32>
    %cst_11 = arith.constant 0.000000e+00 : f32
    %14 = vector.broadcast %cst_11 : f32 to vector<16x384xf32>
    %15 = arith.maximumf %13, %14 : vector<16x384xf32>
    %16 = arith.truncf %15 : vector<16x384xf32> to vector<16x384xbf16>
    %c0_12 = arith.constant 0 : index
    %c0_13 = arith.constant 0 : index
    %17 = vector.load %arg6[%c0_12, %c0_13] : memref<384x256xbf16, #tpu.memory_space<vmem>>, vector<384x256xbf16>
    %cst_14 = arith.constant dense<0.000000e+00> : vector<16x256xf32>
    %18 = tpu.matmul %16, %17, %cst_14 {dimension_numbers = #tpu.dot_dimension_numbers<[1], [0], [0], [1], [0, 0, 1, 1], [], []>} : vector<16x384xbf16>, vector<384x256xbf16>, vector<16x256xf32> -> vector<16x256xf32>
    %c0_15 = arith.constant 0 : index
    %c0_16 = arith.constant 0 : index
    %19 = vector.load %arg7[%c0_15, %c0_16] : memref<1x256xf32, #tpu.memory_space<vmem>>, vector<1x256xf32>
    %20 = vector.broadcast %19 : vector<1x256xf32> to vector<16x256xf32>
    %21 = arith.addf %18, %20 : vector<16x256xf32>
    %cst_17 = arith.constant 0.000000e+00 : f32
    %22 = vector.broadcast %cst_17 : f32 to vector<16x256xf32>
    %23 = arith.maximumf %21, %22 : vector<16x256xf32>
    %24 = arith.truncf %23 : vector<16x256xf32> to vector<16x256xbf16>
    %c0_18 = arith.constant 0 : index
    %c0_19 = arith.constant 0 : index
    %25 = vector.load %arg8[%c0_18, %c0_19] : memref<256x256xbf16, #tpu.memory_space<vmem>>, vector<256x256xbf16>
    %cst_20 = arith.constant dense<0.000000e+00> : vector<16x256xf32>
    %26 = tpu.matmul %24, %25, %cst_20 {dimension_numbers = #tpu.dot_dimension_numbers<[1], [0], [0], [1], [0, 0, 1, 1], [], []>} : vector<16x256xbf16>, vector<256x256xbf16>, vector<16x256xf32> -> vector<16x256xf32>
    %c0_21 = arith.constant 0 : index
    %c0_22 = arith.constant 0 : index
    %27 = vector.load %arg9[%c0_21, %c0_22] : memref<1x256xf32, #tpu.memory_space<vmem>>, vector<1x256xf32>
    %28 = vector.broadcast %27 : vector<1x256xf32> to vector<16x256xf32>
    %29 = arith.addf %26, %28 : vector<16x256xf32>
    %cst_23 = arith.constant 0.000000e+00 : f32
    %30 = vector.broadcast %cst_23 : f32 to vector<16x256xf32>
    %31 = arith.maximumf %29, %30 : vector<16x256xf32>
    %32 = arith.truncf %31 : vector<16x256xf32> to vector<16x256xbf16>
    %c0_24 = arith.constant 0 : index
    %c0_25 = arith.constant 0 : index
    %33 = vector.load %arg10[%c0_24, %c0_25] : memref<256x128xbf16, #tpu.memory_space<vmem>>, vector<256x128xbf16>
    %cst_26 = arith.constant dense<0.000000e+00> : vector<16x128xf32>
    %34 = tpu.matmul %32, %33, %cst_26 {dimension_numbers = #tpu.dot_dimension_numbers<[1], [0], [0], [1], [0, 0, 1, 1], [], []>} : vector<16x256xbf16>, vector<256x128xbf16>, vector<16x128xf32> -> vector<16x128xf32>
    %c0_27 = arith.constant 0 : index
    %c0_28 = arith.constant 0 : index
    %35 = vector.load %arg11[%c0_27, %c0_28] : memref<1x128xf32, #tpu.memory_space<vmem>>, vector<1x128xf32>
    %36 = vector.broadcast %35 : vector<1x128xf32> to vector<16x128xf32>
    %37 = arith.addf %34, %36 : vector<16x128xf32>
    %cst_29 = arith.constant dense<0xFF800000> : vector<16xf32>
    %38 = vector.multi_reduction <maximumf>, %37, %cst_29 [1] : vector<16x128xf32> to vector<16xf32>
    %39 = vector.shape_cast %38 : vector<16xf32> to vector<16x1xf32>
    %40 = vector.broadcast %39 : vector<16x1xf32> to vector<16x128xf32>
    %41 = arith.subf %37, %40 : vector<16x128xf32>
    %42 = math.exp %41 : vector<16x128xf32>
    %cst_30 = arith.constant dense<0.000000e+00> : vector<16xf32>
    %43 = vector.multi_reduction <add>, %42, %cst_30 [1] : vector<16x128xf32> to vector<16xf32>
    %44 = vector.shape_cast %43 : vector<16xf32> to vector<16x1xf32>
    %45 = vector.broadcast %44 : vector<16x1xf32> to vector<16x128xf32>
    %46 = arith.divf %42, %45 : vector<16x128xf32>
    %c0_31 = arith.constant 0 : index
    %c0_32 = arith.constant 0 : index
    %47 = vector.load %arg12[%c0_31, %c0_32] : memref<16x128xf32, #tpu.memory_space<vmem>>, vector<16x128xf32>
    tpu.vector_store %arg12[%c0_31, %c0_32], %46 {strides = array<i32>} : memref<16x128xf32, #tpu.memory_space<vmem>>, vector<16x128xf32>,
    return
  }
  func.func @transform_0(%arg0: i32) -> (i32, i32) {
    %c0_i32 = arith.constant 0 : i32
    %c0_i32_0 = arith.constant 0 : i32
    return %arg0, %c0_i32 : i32, i32
  }
  func.func @transform_1(%arg0: i32) -> (i32, i32) {
    %c0_i32 = arith.constant 0 : i32
    %c0_i32_0 = arith.constant 0 : i32
    %c0_i32_1 = arith.constant 0 : i32
    return %c0_i32, %c0_i32_0 : i32, i32
  }
  func.func @transform_2(%arg0: i32) -> (i32, i32) {
    %c0_i32 = arith.constant 0 : i32
    %c0_i32_0 = arith.constant 0 : i32
    %c0_i32_1 = arith.constant 0 : i32
    return %c0_i32, %c0_i32_0 : i32, i32
  }
  func.func @transform_3(%arg0: i32) -> (i32, i32) {
    %c0_i32 = arith.constant 0 : i32
    %c0_i32_0 = arith.constant 0 : i32
    %c0_i32_1 = arith.constant 0 : i32
    return %c0_i32, %c0_i32_0 : i32, i32
  }
  func.func @transform_4(%arg0: i32) -> (i32, i32) {
    %c0_i32 = arith.constant 0 : i32
    %c0_i32_0 = arith.constant 0 : i32
    %c0_i32_1 = arith.constant 0 : i32
    return %c0_i32, %c0_i32_0 : i32, i32
  }
  func.func @transform_5(%arg0: i32) -> (i32, i32) {
    %c0_i32 = arith.constant 0 : i32
    %c0_i32_0 = arith.constant 0 : i32
    %c0_i32_1 = arith.constant 0 : i32
    return %c0_i32, %c0_i32_0 : i32, i32
  }
  func.func @transform_6(%arg0: i32) -> (i32, i32) {
    %c0_i32 = arith.constant 0 : i32
    %c0_i32_0 = arith.constant 0 : i32
    %c0_i32_1 = arith.constant 0 : i32
    return %c0_i32, %c0_i32_0 : i32, i32
  }
  func.func @transform_7(%arg0: i32) -> (i32, i32) {
    %c0_i32 = arith.constant 0 : i32
    %c0_i32_0 = arith.constant 0 : i32
    %c0_i32_1 = arith.constant 0 : i32
    return %c0_i32, %c0_i32_0 : i32, i32
  }
  func.func @transform_8(%arg0: i32) -> (i32, i32) {
    %c0_i32 = arith.constant 0 : i32
    %c0_i32_0 = arith.constant 0 : i32
    %c0_i32_1 = arith.constant 0 : i32
    return %c0_i32, %c0_i32_0 : i32, i32
  }
  func.func @transform_9(%arg0: i32) -> (i32, i32) {
    %c0_i32 = arith.constant 0 : i32
    %c0_i32_0 = arith.constant 0 : i32
    %c0_i32_1 = arith.constant 0 : i32
    return %c0_i32, %c0_i32_0 : i32, i32
  }
  func.func @transform_10(%arg0: i32) -> (i32, i32) {
    %c0_i32 = arith.constant 0 : i32
    %c0_i32_0 = arith.constant 0 : i32
    %c0_i32_1 = arith.constant 0 : i32
    return %c0_i32, %c0_i32_0 : i32, i32
  }
  func.func @transform_11(%arg0: i32) -> (i32, i32) {
    %c0_i32 = arith.constant 0 : i32
    %c0_i32_0 = arith.constant 0 : i32
    return %arg0, %c0_i32 : i32, i32
  }
}

</mosaic_0001>

<bundles_post_ra>
// kernel: tpu_custom_call.1
= control target key start
LH: loop header
LB: loop body
LE: loop exit
PB: predicated region body
PF: predicated region fallthrough
CT: control target
= control target key end

     0   :  { %16 = vsyncpa [#allocation3], 0  ;;  %s3424_s0 = inlined_call_operand.hbm [shape: bf16[16,42], index: 0, kind: input, shape index: {}]   ;;  %s3425_s1 = inlined_call_operand.hbm [shape: bf16[42,640], index: 1, kind: input, shape index: {}]   ;;  %s3426_s2 = inlined_call_operand.hbm [shape: f32[1,640], index: 2, kind: input, shape index: {}]   ;;  %s3427_s3 = inlined_call_operand.hbm [shape: bf16[640,384], index: 3, kind: input, shape index: {}]   ;;  %s3428_s4 = inlined_call_operand.vmem [shape: f32[1,384], index: 4, kind: input, shape index: {}]   ;;  %s3429_s5 = inlined_call_operand.hbm [shape: bf16[384,256], index: 5, kind: input, shape index: {}]   ;;  %s3430_s6 = inlined_call_operand.vmem [shape: f32[1,256], index: 6, kind: input, shape index: {}]   ;;  %s3431_s7 = inlined_call_operand.hbm [shape: bf16[256,256], index: 7, kind: input, shape index: {}]   ;;  %s3432_s8 = inlined_call_operand.vmem [shape: f32[1,256], index: 8, kind: input, shape index: {}]   ;;  %s3433_s9 = inlined_call_operand.hbm [shape: bf16[256,128], index: 9, kind: input, shape index: {}]   ;;  %s3434_s10 = inlined_call_operand.vmem [shape: f32[1,128], index: 10, kind: input, shape index: {}]   ;;  %s3435_s11 = inlined_call_operand.hbm [shape: f32[16,128], index: 11, kind: output, shape index: {}]  }
   0x1   :  { %17 = vsyncpa [#allocation6], 0 }
   0x2   :  { %18 = vsyncpa [#allocation9], 0 }
   0x3   :  { %19 = vsyncpa [#allocation12], 0 }
   0x4   :  { %20 = vsyncpa [#allocation4], 0  ;;  %s3221_s17 = smov [#allocation5]  }
   0x5   :  { %s38_s18 = sshll.u32 %s3221_s17, 4  ;;  %s39_s18 = int_to_ptr.vmem [resolvable:$true] %s38_s18 }
   0x6   :  { %s3059_s19 = scalar_lea.vmem %s39_s18, 1920  ;;  %p3064_p1 = scmp.lt.s32.totalorder %s39_s18, %s39_s18 }
   0x7   :  { %p3060_p0 = scmp.ne.s32.totalorder %s39_s18, %s3059_s19  ;;  %p3065_p2 = scmp.lt.s32.totalorder %s3059_s19, %s3059_s19 }
   0x9   :  { %p3066_p3 = por %p3065_p2, %p3064_p1 }
   0xb   :  { %p3067_p4 = pnand %p3066_p3, %p3060_p0 }
   0xd   :  { %3070 = shalt.err (!%p3067_p4)
}
   0xe   :  { %s3222_s20 = smov 320   ;;  %s3223_s21 = smov 20  }
   0xf   :  { %44 = dma.hbm_to_vmem [thread:$0]  %s3425_s1, 1920, %s39_s18, [#allocation6], %s3222_s20, %s3222_s20, %s3223_s21  }
  0x10   :  { %s3224_s24 = smov [#allocation8]  }
  0x11   :  { %s60_s25 = sshll.u32 %s3224_s24, 4  ;;  %s61_s25 = int_to_ptr.vmem [resolvable:$true] %s60_s25 }
  0x12   :  { %s3079_s26 = scalar_lea.vmem %s61_s25, 15360  ;;  %p3084_p6 = scmp.lt.s32.totalorder %s61_s25, %s61_s25 }
  0x13   :  { %p3080_p5 = scmp.ne.s32.totalorder %s61_s25, %s3079_s26  ;;  %p3085_p7 = scmp.lt.s32.totalorder %s3079_s26, %s3079_s26 }
  0x15   :  { %p3086_p8 = por %p3085_p7, %p3084_p6 }
  0x17   :  { %p3087_p9 = pnand %p3086_p8, %p3080_p5 }
  0x19   :  { %3090 = shalt.err (!%p3087_p9)
}
  0x1a   :  { %s3225_s27 = smov 192   ;;  %s3226_s28 = smov 12  }
  0x1b   :  { %66 = dma.hbm_to_vmem [thread:$0]  %s3427_s3, 15360, %s61_s25, [#allocation9], %s3225_s27, %s3225_s27, %s3226_s28  }
  0x1c   :  { %s3227_s12 = smov [#allocation11]   ;;  %s3228_s14 = smov [#allocation2]  }
  0x1d   :  { %s88_s13 = sshll.u32 %s3227_s12, 4  ;;  %s26_s1 = sshll.u32 %s3228_s14, 4  ;;  %s89_s13 = int_to_ptr.vmem [resolvable:$true] %s88_s13  ;;  %s27_s1 = int_to_ptr.vmem [resolvable:$true] %s26_s1 }
  0x1e   :  { %s3099_s15 = scalar_lea.vmem %s89_s13, 4096  ;;  %p3104_p11 = scmp.lt.s32.totalorder %s89_s13, %s89_s13 }
  0x1f   :  { %p3100_p10 = scmp.ne.s32.totalorder %s89_s13, %s3099_s15  ;;  %p3105_p12 = scmp.lt.s32.totalorder %s3099_s15, %s3099_s15 }
  0x21   :  { %p3106_p13 = por %p3105_p12, %p3104_p11 }
  0x23   :  { %p3107_p0 = pnand %p3106_p13, %p3100_p10 }
  0x25   :  { %3110 = shalt.err (!%p3107_p0)
}
  0x26   :  { %s3229_s16 = smov 128   ;;  %s3230_s17 = smov 8  }
  0x27   :  { %94 = dma.hbm_to_vmem [thread:$0]  %s3431_s7, 4096, %s89_s13, [#allocation12], %s3229_s16, %s3229_s16, %s3230_s17  }
  0x28   :  { %s3119_s19 = scalar_lea.vmem %s27_s1, 128  ;;  %p3124_p2 = scmp.lt.s32.totalorder %s27_s1, %s27_s1 }
  0x29   :  { %p3120_p1 = scmp.ne.s32.totalorder %s27_s1, %s3119_s19  ;;  %p3125_p3 = scmp.lt.s32.totalorder %s3119_s19, %s3119_s19 }
  0x2b   :  { %p3126_p4 = por %p3125_p3, %p3124_p2 }
  0x2d   :  { %p3127_p5 = pnand %p3126_p4, %p3120_p1 }
  0x2f   :  { %3130 = shalt.err (!%p3127_p5)
}
  0x30   :  { %s3231_s20 = smov 64   ;;  %s3232_s21 = smov 4  }
  0x31   :  { %32 = dma.hbm_to_vmem [thread:$0]  %s3424_s0, 128, %s27_s1, [#allocation3], %s3231_s20, %s3231_s20, %s3232_s21  }
  0x32   :  { %s3233_s24 = smov [#allocation7]   ;;  %s3234_s26 = smov [#allocation10]  }
  0x33   :  { %s51_s25 = sshll.u32 %s3233_s24, 4  ;;  %s74_s7 = sshll.u32 %s3234_s26, 4  ;;  %s52_s25 = int_to_ptr.vmem [resolvable:$true] %s51_s25  ;;  %s75_s7 = int_to_ptr.vmem [resolvable:$true] %s74_s7 }
  0x34   :  { %s3139_s27 = scalar_lea.vmem %s52_s25, 80  ;;  %s3143_s28 = scalar_lea.vmem %s52_s25, 96 }
  0x35   :  { %p3140_p6 = scmp.ne.s32.totalorder %s52_s25, %s3139_s27  ;;  %p3144_p7 = scmp.lt.s32.totalorder %s52_s25, %s52_s25 }
  0x36   :  { %p3145_p8 = scmp.lt.s32.totalorder %s3143_s28, %s3139_s27 }
  0x38   :  { %p3146_p9 = por %p3145_p8, %p3144_p7 }
  0x3a   :  { %p3147_p10 = pnand %p3146_p9, %p3140_p6 }
  0x3c   :  { %3150 = shalt.err (!%p3147_p10)
}
  0x3d   :  { %54 = dma.hbm_to_vmem [thread:$0]  %s3426_s2, 80, %s52_s25, [#allocation6]  }
  0x3e   :  { %s3159_s12 = scalar_lea.vmem %s75_s7, 6144  ;;  %p3164_p12 = scmp.lt.s32.totalorder %s75_s7, %s75_s7 }
  0x3f   :  { %p3160_p11 = scmp.ne.s32.totalorder %s75_s7, %s3159_s12  ;;  %p3165_p13 = scmp.lt.s32.totalorder %s3159_s12, %s3159_s12 }
  0x41   :  { %p3166_p0 = por %p3165_p13, %p3164_p12 }
  0x43   :  { %p3167_p1 = pnand %p3166_p0, %p3160_p11 }
  0x45   :  { %3170 = shalt.err (!%p3167_p1)
}
  0x46   :  { %80 = dma.hbm_to_vmem [thread:$0]  %s3429_s5, 6144, %s75_s7, [#allocation9], %s3229_s16, %s3229_s16, %s3230_s17  }
  0x47   :  { %s3235_s14 = smov [#allocation13]  }
  0x48   :  { %s102_s1 = sshll.u32 %s3235_s14, 4  ;;  %s103_s1 = int_to_ptr.vmem [resolvable:$true] %s102_s1 }
  0x49   :  { %s3179_s15 = scalar_lea.vmem %s103_s1, 2048  ;;  %p3184_p3 = scmp.lt.s32.totalorder %s103_s1, %s103_s1 }
  0x4a   :  { %p3180_p2 = scmp.ne.s32.totalorder %s103_s1, %s3179_s15  ;;  %p3185_p4 = scmp.lt.s32.totalorder %s3179_s15, %s3179_s15 }
  0x4c   :  { %p3186_p5 = por %p3185_p4, %p3184_p3 }
  0x4e   :  { %p3187_p6 = pnand %p3186_p5, %p3180_p2 }
  0x50   :  { %3190 = shalt.err (!%p3187_p6)
}
  0x51   :  { %108 = dma.hbm_to_vmem [thread:$0]  %s3433_s9, 2048, %s103_s1, [#allocation12], %s3231_s20, %s3231_s20, %s3232_s21  }
  0x52   :  { %3211 = dma.done.wait [#allocation3], 128  }
  0x53   :  { %3212 = vsyncadd [#allocation3], 4294967168 }
  0x54   :  { %3213 = dma.done.wait [#allocation6], 2000  }
  0x55   :  { %3214 = vsyncadd [#allocation6], 4294965296 }
  0x56   :  { %3215 = dma.done.wait [#allocation9], 21504  }
  0x57   :  { %3216 = vsyncadd [#allocation9], 4294945792 }
  0x58   :  { %3217 = dma.done.wait [#allocation12], 6144  }
  0x59   :  { %3218 = vsyncadd [#allocation12], 4294961152  ;;  %v3236_v0 = vmov 0   ;;  %vm262_vm0 = vcmask 1044480   ;;  %v2731_v5 = vld [vmem:[#allocation5 + $0x2c] ss:$20 sps:$4 sm:$0xff]  }
  0x5a   :  { %310 = vmatprep.mubr.bf16.mxu0 %v3236_v0  ;;  %353 = vmatprep.mubr.bf16.mxu1 %v3236_v0  ;;  %v2725_v1 = vld [vmem:[#allocation5 + $0x54] ss:$20 sps:$4 sm:$0x1f]   ;;  %v2727_v2 = vld [vmem:[#allocation5 + $0x5c] ss:$20 sps:$4 sm:$0x1f]  }
  0x5b   :  { %2375 = vmatprep.subr.msk.bf16.mxu0 %vm262_vm0, %v2725_v1  ;;  %v2729_v3 = vld [vmem:[#allocation5 + $0x50] ss:$20 sps:$4 sm:$0x1f]   ;;  %v2730_v4 = vld [vmem:[#allocation5 + $0x58] ss:$20 sps:$4 sm:$0x1f]   ;;  %2377 = vmatprep.subr.msk.bf16.mxu1 %vm262_vm0, %v2727_v2 }
  0x5c   :  { %v264_v6 = vsel %vm262_vm0, %v2729_v3, 0  ;;  %v270_v7 = vsel %vm262_vm0, %v2730_v4, 0  ;;  %v2733_v8 = vld [vmem:[#allocation5 + $0x34] ss:$20 sps:$4 sm:$0xff]   ;;  %v2736_v10 = vld [vmem:[#allocation5 + $0x30] ss:$20 sps:$4 sm:$0xff]  }
  0x5d   :  { %289 = vmatpush1.bf16.msra.mxu0 %v264_v6  ;;  %332 = vmatpush1.bf16.msra.mxu1 %v270_v7  ;;  %v2735_v9 = vld [vmem:[#allocation5 + $0x28] ss:$20 sps:$4 sm:$0xff]   ;;  %v2737_v11 = vld [vmem:[#allocation5 + $0x4] ss:$20 sps:$4 sm:$0xff]   ;;  %v2739_v12 = vld [vmem:[#allocation5 + $0xc] ss:$20 sps:$4 sm:$0xff]  }
  0x5e   :  { %290 = vmatprep.subr.bf16.mxu0 %v2731_v5  ;;  %333 = vmatprep.subr.bf16.mxu1 %v2733_v8  ;;  %v2741_v13 = vld [vmem:[#allocation5] ss:$20 sps:$4 sm:$0xff]   ;;  %v2742_v14 = vld [vmem:[#allocation5 + $0x8] ss:$20 sps:$4 sm:$0xff]   ;;  %vm258_vm1 = vcmask 343040   ;;  %v3237_v18 = vmov 0.0  }
  0x5f   :  { %v2744_v15 = vld [vmem:[#allocation5 + $0x60] ss:$20 sps:$4 sm:$0x1f]   ;;  %v2743_v16 = vld [vmem:[#allocation2] sm:$0xff]   ;;  %vm3238_vm2 = vmmov 0  }
  0x60   :  { %v2749_v17 = vld [vmem:[#allocation8 + $0xac] ss:$12 sps:$4 sm:$0xff]   ;;  %v276_v19 = vsel %vm262_vm0, %v2744_v15, 0  ;;  %v2747_v20 = vld [vmem:[#allocation8 + $0xa8] ss:$12 sps:$4 sm:$0xff]  }
  0x61   :  { %291 = vmatpush1.bf16.msra.mxu0 %v2735_v9  ;;  %334 = vmatpush1.bf16.msra.mxu1 %v2736_v10  ;;  %v2755_v21 = vld [vmem:[#allocation8 + $0x94] ss:$12 sps:$4 sm:$0xff]   ;;  %v2745_v22 = vld [vmem:[#allocation5 + $0x38] ss:$20 sps:$4 sm:$0xff]  }
  0x62   :  { %292 = vmatprep.subr.bf16.mxu0 %v2737_v11  ;;  %335 = vmatprep.subr.bf16.mxu1 %v2739_v12  ;;  %v2753_v23 = vld [vmem:[#allocation8 + $0x90] ss:$12 sps:$4 sm:$0xff]   ;;  %v2752_v26 = vld [vmem:[#allocation8 + $0x22c] ss:$12 sps:$4 sm:$0xff]   ;;  %v2750_v29 = vld [vmem:[#allocation8 + $0x228] ss:$12 sps:$4 sm:$0xff]  }
  0x63   :  { %v2761_v24 = vld [vmem:[#allocation8 + $0x7c] ss:$12 sps:$4 sm:$0xff]   ;;  %v2759_v27 = vld [vmem:[#allocation8 + $0x78] ss:$12 sps:$4 sm:$0xff]   ;;  %v2758_v30 = vld [vmem:[#allocation8 + $0x214] ss:$12 sps:$4 sm:$0xff]  }
  0x64   :  { %v2746_v25 = vld [vmem:[#allocation5 + $0x10] ss:$20 sps:$4 sm:$0xff]   ;;  %v2765_v31 = vld [vmem:[#allocation8 + $0x60] ss:$12 sps:$4 sm:$0xff]  }
  0x65   :  { %293 = vmatpush1.bf16.msra.mxu0 %v2741_v13  ;;  %336 = vmatpush1.bf16.msra.mxu1 %v2742_v14  ;;  %v2767_v28 = vld [vmem:[#allocation8 + $0x64] ss:$12 sps:$4 sm:$0xff]   ;;  %v2773_v32 = vld [vmem:[#allocation8 + $0x4c] ss:$12 sps:$4 sm:$0xff]   ;;  %v2764_v34 = vld [vmem:[#allocation8 + $0x1fc] ss:$12 sps:$4 sm:$0xff]  }
  0x66   :  { %2676 = vmatprep.subr.bf16.mxu0 %v3237_v18  ;;  %1237 = vmatprep.subr.bf16.mxu1 %v2749_v17  ;;  %v2756_v33 = vld [vmem:[#allocation8 + $0x210] ss:$12 sps:$4 sm:$0xff]   ;;  %v2771_v35 = vld [vmem:[#allocation8 + $0x48] ss:$12 sps:$4 sm:$0xff]   ;;  %v2762_v37 = vld [vmem:[#allocation8 + $0x1f8] ss:$12 sps:$4 sm:$0xff]  }
  0x67   :  { %v2779_v36 = vld [vmem:[#allocation8 + $0x34] ss:$12 sps:$4 sm:$0xff]   ;;  %v2770_v38 = vld [vmem:[#allocation8 + $0x1e4] ss:$12 sps:$4 sm:$0xff]   ;;  %v2785_v40 = vld [vmem:[#allocation8 + $0x1c] ss:$12 sps:$4 sm:$0xff]  }
  0x68   :  { %2376 = vmatmul.mubr.msk.bf16.vlgmr.msra.gmra.mxu0 %vm258_vm1, %v2743_v16  ;;  %2378 = vmatmul.mubr.msk.bf16.vlgmr.msra.gmra.mxu1 %vm258_vm1, %v2743_v16  ;;  %v2777_v39 = vld [vmem:[#allocation8 + $0x30] ss:$12 sps:$4 sm:$0xff]   ;;  %v2768_v41 = vld [vmem:[#allocation8 + $0x1e0] ss:$12 sps:$4 sm:$0xff]   ;;  %v2783_v43 = vld [vmem:[#allocation8 + $0x18] ss:$12 sps:$4 sm:$0xff]  }
  0x69   :  { %2677 = vmatpush3.bf16.msra.mxu0 %v276_v19  ;;  %2682 = vmatprep.mubr.msk.bf16.mxu0 %vm3238_vm2, %v3237_v18  ;;  %v2776_v42 = vld [vmem:[#allocation8 + $0x1cc] ss:$12 sps:$4 sm:$0xff]   ;;  %v2791_v44 = vld [vmem:[#allocation8 + $0x4] ss:$12 sps:$4 sm:$0xff]   ;;  %v2774_v45 = vld [vmem:[#allocation8 + $0x1c8] ss:$12 sps:$4 sm:$0xff]  }
  0x6a   :  { %2678 = vmatprep.subr.bf16.mxu0 %v3237_v18  ;;  %1238 = vmatpush1.bf16.msra.mxu1 %v2747_v20  ;;  %v2782_v46 = vld [vmem:[#allocation8 + $0x1b4] ss:$12 sps:$4 sm:$0xff]   ;;  %v2797_v48 = vld [vmem:[#allocation8 + $0x16c] ss:$12 sps:$4 sm:$0xff]   ;;  %v2780_v49 = vld [vmem:[#allocation8 + $0x1b0] ss:$12 sps:$4 sm:$0xff]  }
  0x6b   :  { %1239 = vmatprep.subr.bf16.mxu1 %v2755_v21  ;;  %v2789_v47 = vld [vmem:[#allocation8] ss:$12 sps:$4 sm:$0xff]   ;;  %v2788_v50 = vld [vmem:[#allocation8 + $0x19c] ss:$12 sps:$4 sm:$0xff]   ;;  %v2786_v52 = vld [vmem:[#allocation8 + $0x198] ss:$12 sps:$4 sm:$0xff]  }
  0x6c   :  { %v2795_v51 = vld [vmem:[#allocation8 + $0x168] ss:$12 sps:$4 sm:$0xff]   ;;  %v2794_v54 = vld [vmem:[#allocation8 + $0x184] ss:$12 sps:$4 sm:$0xff]   ;;  %v2792_v57 = vld [vmem:[#allocation8 + $0x180] ss:$12 sps:$4 sm:$0xff]  }
  0x6d   :  { %2679 = vmatpush3.bf16.msra.mxu0 %v2745_v22  ;;  %v2803_v53 = vld [vmem:[#allocation8 + $0x154] ss:$12 sps:$4 sm:$0xff]   ;;  %v2801_v55 = vld [vmem:[#allocation8 + $0x150] ss:$12 sps:$4 sm:$0xff]   ;;  %v2800_v58 = vld [vmem:[#allocation8 + $0x2ec] ss:$12 sps:$4 sm:$0xff]  }
  0x6e   :  { %2680 = vmatprep.subr.bf16.mxu0 %v3237_v18  ;;  %1240 = vmatpush1.bf16.msra.mxu1 %v2753_v23  ;;  %v2809_v56 = vld [vmem:[#allocation8 + $0x13c] ss:$12 sps:$4 sm:$0xff]   ;;  %v2807_v59 = vld [vmem:[#allocation8 + $0x138] ss:$12 sps:$4 sm:$0xff]   ;;  %v2806_v62 = vld [vmem:[#allocation8 + $0x2d4] ss:$12 sps:$4 sm:$0xff]  }
  0x6f   :  { %1241 = vmatprep.subr.bf16.mxu1 %v2761_v24  ;;  %v2815_v60 = vld [vmem:[#allocation8 + $0x124] ss:$12 sps:$4 sm:$0xff]   ;;  %v2798_v61 = vld [vmem:[#allocation8 + $0x2e8] ss:$12 sps:$4 sm:$0xff]   ;;  %v2813_v63 = vld [vmem:[#allocation8 + $0x120] ss:$12 sps:$4 sm:$0xff]  }
  0x70   :  { %v2821_v1 = vld [vmem:[#allocation8 + $0x10c] ss:$12 sps:$4 sm:$0xff]   ;;  %v2804_v2 = vld [vmem:[#allocation8 + $0x2d0] ss:$12 sps:$4 sm:$0xff]   ;;  %v2819_v4 = vld [vmem:[#allocation8 + $0x108] ss:$12 sps:$4 sm:$0xff]  }
  0x71   :  { %2681 = vmatpush3.bf16.msra.mxu0 %v2746_v25  ;;  %v2812_v3 = vld [vmem:[#allocation8 + $0x2bc] ss:$12 sps:$4 sm:$0xff]   ;;  %v2810_v5 = vld [vmem:[#allocation8 + $0x2b8] ss:$12 sps:$4 sm:$0xff]   ;;  %v2816_v7 = vld [vmem:[#allocation8 + $0x2a0] ss:$12 sps:$4 sm:$0xff]   ;;  %v155_v25 = vlaneseq }
  0x72   :  { %1280 = vmatprep.subr.bf16.mxu0 %v2752_v26  ;;  %1242 = vmatpush1.bf16.msra.mxu1 %v2759_v27  ;;  %v2818_v6 = vld [vmem:[#allocation8 + $0x2a4] ss:$12 sps:$4 sm:$0xff]   ;;  %v2824_v8 = vld [vmem:[#allocation8 + $0x28c] ss:$12 sps:$4 sm:$0xff]   ;;  %v2822_v9 = vld [vmem:[#allocation8 + $0x288] ss:$12 sps:$4 sm:$0xff]  }
  0x73   :  { %1243 = vmatprep.subr.bf16.mxu1 %v2767_v28  ;;  %v2827_v10 = vld [vmem:[#allocation8 + $0xf4] ss:$12 sps:$4 sm:$0xff]   ;;  %v2825_v12 = vld [vmem:[#allocation8 + $0xf0] ss:$12 sps:$4 sm:$0xff]   ;;  %v2834_v17 = vld [vmem:[#allocation8 + $0x258] ss:$12 sps:$4 sm:$0xff]  }
  0x74   :  { %2683 = vmatmul.mubr.msk.bf16.vlgmr.msra.gmra.mxu0 %vm258_vm1, %v2743_v16  ;;  %v2830_v11 = vld [vmem:[#allocation8 + $0x274] ss:$12 sps:$4 sm:$0xff]   ;;  %v2828_v13 = vld [vmem:[#allocation8 + $0x270] ss:$12 sps:$4 sm:$0xff]   ;;  %v2831_v16 = vld [vmem:[#allocation8 + $0xd8] ss:$12 sps:$4 sm:$0xff]  }
  0x75   :  { %1281 = vmatpush1.bf16.msra.mxu0 %v2750_v29  ;;  %v2833_v14 = vld [vmem:[#allocation8 + $0xdc] ss:$12 sps:$4 sm:$0xff]   ;;  %v2839_v19 = vld [vmem:[#allocation8 + $0xc4] ss:$12 sps:$4 sm:$0xff]   ;;  %v2837_v21 = vld [vmem:[#allocation8 + $0xc0] ss:$12 sps:$4 sm:$0xff]  }
  0x76   :  { %1282 = vmatprep.subr.bf16.mxu0 %v2758_v30  ;;  %1244 = vmatpush1.bf16.msra.mxu1 %v2765_v31  ;;  %v2836_v15 = vld [vmem:[#allocation8 + $0x25c] ss:$12 sps:$4 sm:$0xff]   ;;  %v2842_v20 = vld [vmem:[#allocation8 + $0x244] ss:$12 sps:$4 sm:$0xff]   ;;  %v2840_v22 = vld [vmem:[#allocation8 + $0x240] ss:$12 sps:$4 sm:$0xff]  }
  0x77   :  { %1245 = vmatprep.subr.bf16.mxu1 %v2773_v32  ;;  %v2845_v23 = vld [vmem:[#allocation8 + $0x3ac] ss:$12 sps:$4 sm:$0xff]   ;;  %v2846_v24 = vld [vmem:[#allocation8 + $0x170] ss:$12 sps:$4 sm:$0xff]   ;;  %v3348_v26 = vshrl.u32 %v155_v25, 7 }
  0x78   :  { %v3352_v29 = vld [vmem:[#allocation7] sm:$0x1f]  ;;  %v2870_v25 = vld [vmem:[#allocation8 + $0x334] ss:$12 sps:$4 sm:$0xff]  }
  0x79   :  { %1283 = vmatpush1.bf16.msra.mxu0 %v2756_v33  ;;  %v165_v27 = vsub.s32 2, %v3348_v26  ;;  %v169_v28 = vsub.s32 3, %v3348_v26  ;;  %v3355_v30 = vsub.s32 1, %v3348_v26  ;;  %v3358_v31 = vsub.s32 0, %v3348_v26 }
  0x7a   :  { %1284 = vmatprep.subr.bf16.mxu0 %v2764_v34  ;;  %1246 = vmatpush1.bf16.msra.mxu1 %v2771_v35 }
  0x7b   :  { %1247 = vmatprep.subr.bf16.mxu1 %v2779_v36  ;;  %v166_v32 = vrot.slane %v3352_v29, %v165_v27  ;;  %v170_v33 = vrot.slane %v3352_v29, %v169_v28  ;;  %v162_v36 = vrot.slane %v3352_v29, %v3355_v30  ;;  %v2871_v28 = vld [vmem:[#allocation8 + $0xf8] ss:$12 sps:$4 sm:$0xff]  }
  0x7d   :  { %1285 = vmatpush1.bf16.msra.mxu0 %v2762_v37  ;;  %v158_v37 = vrot.slane %v3352_v29, %v3358_v31 }
  0x7e   :  { %1286 = vmatprep.subr.bf16.mxu0 %v2770_v38  ;;  %1248 = vmatpush1.bf16.msra.mxu1 %v2777_v39 }
  0x7f   :  { %1249 = vmatprep.subr.bf16.mxu1 %v2785_v40 }
  0x81   :  { %1287 = vmatpush1.bf16.msra.mxu0 %v2768_v41 }
  0x82   :  { %1288 = vmatprep.subr.bf16.mxu0 %v2776_v42  ;;  %1250 = vmatpush1.bf16.msra.mxu1 %v2783_v43 }
  0x83   :  { %1251 = vmatprep.subr.bf16.mxu1 %v2791_v44 }
  0x85   :  { %1289 = vmatpush1.bf16.msra.mxu0 %v2774_v45 }
  0x86   :  { %1290 = vmatprep.subr.bf16.mxu0 %v2782_v46  ;;  %1252 = vmatpush1.bf16.msra.mxu1 %v2789_v47 }
  0x87   :  { %1253 = vmatprep.subr.bf16.mxu1 %v2797_v48 }
  0x89   :  { %1291 = vmatpush1.bf16.msra.mxu0 %v2780_v49 }
  0x8a   :  { %1292 = vmatprep.subr.bf16.mxu0 %v2788_v50  ;;  %1254 = vmatpush2.bf16.msra.mxu1 %v2795_v51 }
  0x8b   :  { %1255 = vmatprep.subr.bf16.mxu1 %v2803_v53 }
  0x8d   :  { %1293 = vmatpush1.bf16.msra.mxu0 %v2786_v52 }
  0x8e   :  { %1294 = vmatprep.subr.bf16.mxu0 %v2794_v54  ;;  %1256 = vmatpush2.bf16.msra.mxu1 %v2801_v55 }
  0x8f   :  { %1257 = vmatprep.subr.bf16.mxu1 %v2809_v56 }
  0x91   :  { %1295 = vmatpush1.bf16.msra.mxu0 %v2792_v57 }
  0x92   :  { %1296 = vmatprep.subr.bf16.mxu0 %v2800_v58  ;;  %1258 = vmatpush2.bf16.msra.mxu1 %v2807_v59 }
  0x93   :  { %1259 = vmatprep.subr.bf16.mxu1 %v2815_v60 }
  0x95   :  { %1297 = vmatpush2.bf16.msra.mxu0 %v2798_v61 }
  0x96   :  { %1298 = vmatprep.subr.bf16.mxu0 %v2806_v62  ;;  %1260 = vmatpush2.bf16.msra.mxu1 %v2813_v63  ;;  %v2843_v63 = vld [vmem:[#allocation8 + $0x3a8] ss:$12 sps:$4 sm:$0xff]  }
  0x97   :  { %1261 = vmatprep.subr.bf16.mxu1 %v2821_v1  ;;  %v2847_v1 = vld [vmem:[#allocation8 + $0xb0] ss:$12 sps:$4 sm:$0xff]  }
  0x99   :  { %1299 = vmatpush2.bf16.msra.mxu0 %v2804_v2 }
  0x9a   :  { %1300 = vmatprep.subr.bf16.mxu0 %v2812_v3  ;;  %1262 = vmatpush2.bf16.msra.mxu1 %v2819_v4  ;;  %v2850_v3 = vld [vmem:[#allocation8 + $0x394] ss:$12 sps:$4 sm:$0xff]  }
  0x9b   :  { %1263 = vmatprep.subr.bf16.mxu1 %v2827_v10  ;;  %v2856_v10 = vld [vmem:[#allocation8 + $0x140] ss:$12 sps:$4 sm:$0xff]  }
  0x9d   :  { %1301 = vmatpush2.bf16.msra.mxu0 %v2810_v5  ;;  %v2851_v5 = vld [vmem:[#allocation8 + $0x158] ss:$12 sps:$4 sm:$0xff]  }
  0x9e   :  { %1302 = vmatprep.subr.bf16.mxu0 %v2818_v6  ;;  %1264 = vmatpush2.bf16.msra.mxu1 %v2825_v12 }
  0x9f   :  { %1265 = vmatprep.subr.bf16.mxu1 %v2833_v14  ;;  %v2857_v14 = vld [vmem:[#allocation8 + $0x80] ss:$12 sps:$4 sm:$0xff]  }
  0xa1   :  { %1303 = vmatpush2.bf16.msra.mxu0 %v2816_v7  ;;  %v2848_v7 = vld [vmem:[#allocation8 + $0x390] ss:$12 sps:$4 sm:$0xff]  }
  0xa2   :  { %1304 = vmatprep.subr.bf16.mxu0 %v2824_v8  ;;  %1266 = vmatpush2.bf16.msra.mxu1 %v2831_v16  ;;  %v2852_v8 = vld [vmem:[#allocation8 + $0x98] ss:$12 sps:$4 sm:$0xff]   ;;  %v2861_v16 = vld [vmem:[#allocation8 + $0x128] ss:$12 sps:$4 sm:$0xff]  }
  0xa3   :  { %1267 = vmatprep.subr.bf16.mxu1 %v2839_v19  ;;  %v2862_v19 = vld [vmem:[#allocation8 + $0x68] ss:$12 sps:$4 sm:$0xff]  }
  0xa5   :  { %1305 = vmatpush2.bf16.msra.mxu0 %v2822_v9  ;;  %v2855_v9 = vld [vmem:[#allocation8 + $0x37c] ss:$12 sps:$4 sm:$0xff]  }
  0xa6   :  { %1306 = vmatprep.subr.bf16.mxu0 %v2830_v11  ;;  %1268 = vmatpush2.bf16.msra.mxu1 %v2837_v21  ;;  %v2866_v21 = vld [vmem:[#allocation8 + $0x110] ss:$12 sps:$4 sm:$0xff]  }
  0xa7   :  { %1323 = vmatprep.subr.bf16.mxu1 %v2845_v23  ;;  %v2867_v23 = vld [vmem:[#allocation8 + $0x50] ss:$12 sps:$4 sm:$0xff]  }
  0xa9   :  { %1307 = vmatpush2.bf16.msra.mxu0 %v2828_v13  ;;  %v2853_v13 = vld [vmem:[#allocation8 + $0x378] ss:$12 sps:$4 sm:$0xff]  }
  0xaa   :  { %1308 = vmatprep.subr.bf16.mxu0 %v2836_v15  ;;  %v2860_v15 = vld [vmem:[#allocation8 + $0x364] ss:$12 sps:$4 sm:$0xff]  }
  0xad   :  { %1309 = vmatpush2.bf16.msra.mxu0 %v2834_v17  ;;  %v2858_v17 = vld [vmem:[#allocation8 + $0x360] ss:$12 sps:$4 sm:$0xff]  }
  0xae   :  { %1310 = vmatprep.subr.bf16.mxu0 %v2842_v20  ;;  %v2865_v20 = vld [vmem:[#allocation8 + $0x34c] ss:$12 sps:$4 sm:$0xff]  }
  0xb1   :  { %1311 = vmatpush2.bf16.msra.mxu0 %v2840_v22  ;;  %v2863_v22 = vld [vmem:[#allocation8 + $0x348] ss:$12 sps:$4 sm:$0xff]  }
  0xb2   :  { %2601 = vmatprep.subr.bf16.mxu0 %v2846_v24  ;;  %v173_v24 = vsub.s32 4, %v3348_v26 }
 0x128   :  { %v312_v34 = vpop.f32.mrf.mxu0  ;;  %v355_v35 = vpop.f32.mrf.mxu1 }
 0x129   :  { %v356_v38 = vadd.f32 %v355_v35, %v166_v32  ;;  %v313_v47 = vadd.f32 %v312_v34, %v158_v37  ;;  %v174_v34 = vrot.slane %v3352_v29, %v173_v24  ;;  %v2875_v35 = vld [vmem:[#allocation8 + $0x31c] ss:$12 sps:$4 sm:$0xff]   ;;  %v2931_v24 = vld [vmem:[#allocation10 + $0xf0] ss:$8 sps:$4 sm:$0xff]  }
 0x12a   :  { %v314_v39 = vpop.f32.mrf.mxu0  ;;  %v357_v40 = vpop.f32.mrf.mxu1 }
 0x12b   :  { %v358_v41 = vadd.f32 %v357_v40, %v170_v33  ;;  %v315_v44 = vadd.f32 %v314_v39, %v162_v36  ;;  %v407_v48 = vmax.f32 %v356_v38, 0.0  ;;  %v405_v59 = vmax.f32 %v313_v47, 0.0  ;;  %v2877_v38 = vld [vmem:[#allocation8 + $0x20] ss:$12 sps:$4 sm:$0xff]   ;;  %v2884_v47 = vld [vmem:[#allocation8 + $0x230] ss:$12 sps:$4 sm:$0xff]  }
 0x12c   :  { %v316_v42 = vpop.f32.mrf.mxu0  ;;  %v359_v43 = vpop.f32.mrf.mxu1 }
 0x12d   :  { %v317_v45 = vadd.f32 %v316_v42, %v158_v37  ;;  %v360_v46 = vadd.f32 %v359_v43, %v166_v32  ;;  %v408_v51 = vmax.f32 %v358_v41, 0.0  ;;  %v406_v56 = vmax.f32 %v315_v44, 0.0  ;;  %v2868_v32 = vld [vmem:[#allocation8 + $0x330] ss:$12 sps:$4 sm:$0xff]   ;;  %v2873_v37 = vld [vmem:[#allocation8 + $0x318] ss:$12 sps:$4 sm:$0xff]  }
 0x12e   :  { %v318_v49 = vpop.f32.mrf.mxu0  ;;  %v361_v50 = vpop.f32.mrf.mxu1  ;;  %v2880_v41 = vld [vmem:[#allocation8 + $0x304] ss:$12 sps:$4 sm:$0xff]   ;;  %v2881_v42 = vld [vmem:[#allocation8 + $0xc8] ss:$12 sps:$4 sm:$0xff]   ;;  %v2878_v43 = vld [vmem:[#allocation8 + $0x300] ss:$12 sps:$4 sm:$0xff]  }
 0x12f   :  { %v412_v52 = vmax.f32 %v360_v46, 0.0  ;;  %v319_v53 = vadd.f32 %v318_v49, %v162_v36  ;;  %v362_v54 = vadd.f32 %v361_v50, %v170_v33  ;;  %v410_v55 = vmax.f32 %v317_v45, 0.0  ;;  %v2872_v33 = vld [vmem:[#allocation8 + $0x38] ss:$12 sps:$4 sm:$0xff]   ;;  %v2876_v36 = vld [vmem:[#allocation8 + $0xe0] ss:$12 sps:$4 sm:$0xff]  }
 0x130   :  { %v2882_v44 = vld [vmem:[#allocation8 + $0x8] ss:$12 sps:$4 sm:$0xff]   ;;  %v2883_v46 = vld [vmem:[#allocation8 + $0x2f0] ss:$12 sps:$4 sm:$0xff]   ;;  %v2886_v50 = vld [vmem:[#allocation8 + $0x2d8] ss:$12 sps:$4 sm:$0xff]  }
 0x131   :  { %v411_v57 = vmax.f32 %v319_v53, 0.0  ;;  %v413_v58 = vmax.f32 %v362_v54, 0.0  ;;  %v3368_v60 = vpack.c.bf16 %v412_v52, %v407_v48  ;;  %v3372_v2 = vpack.c.bf16 %v410_v55, %v405_v59  ;;  %v2885_v49 = vld [vmem:[#allocation8 + $0x3b0] ss:$12 sps:$4 sm:$0xff]   ;;  %v2888_v52 = vld [vmem:[#allocation8 + $0x398] ss:$12 sps:$4 sm:$0xff]  }
 0x132   :  { %v2889_v53 = vld [vmem:[#allocation8 + $0x2c0] ss:$12 sps:$4 sm:$0xff]   ;;  %v2895_v59 = vld [vmem:[#allocation8 + $0x290] ss:$12 sps:$4 sm:$0xff]  }
 0x133   :  { %v416_v61 = vpack.c.bf16 %v411_v57, %v406_v56  ;;  %v3370_v62 = vpack.c.bf16 %v413_v58, %v408_v51  ;;  %v2887_v51 = vld [vmem:[#allocation8 + $0x218] ss:$12 sps:$4 sm:$0xff]   ;;  %v2890_v54 = vld [vmem:[#allocation8 + $0x200] ss:$12 sps:$4 sm:$0xff]   ;;  %v2892_v56 = vld [vmem:[#allocation8 + $0x2a8] ss:$12 sps:$4 sm:$0xff]  }
 0x134   :  { %v398_v4 = vpop.f32.mrf.mxu0  ;;  %v2891_v55 = vld [vmem:[#allocation8 + $0x380] ss:$12 sps:$4 sm:$0xff]   ;;  %v2893_v57 = vld [vmem:[#allocation8 + $0x1e8] ss:$12 sps:$4 sm:$0xff]  }
 0x135   :  { %1269 = vmatprep.mubr.bf16.mxu1 %v416_v61  ;;  %1312 = vmatprep.mubr.bf16.mxu0 %v3370_v62  ;;  %v399_v39 = vadd.f32 %v398_v4, %v174_v34  ;;  %v2894_v58 = vld [vmem:[#allocation8 + $0x368] ss:$12 sps:$4 sm:$0xff]   ;;  %v2902_v4 = vld [vmem:[#allocation8 + $0x1a0] ss:$12 sps:$4 sm:$0xff]  }
 0x136   :  { %1270 = vmatmul.mubr.bf16.vlgmr.msra.gmra.mxu1 %v3372_v2  ;;  %1313 = vmatmul.mubr.bf16.vlgmr.msra.gmra.mxu0 %v3368_v60  ;;  %v2684_v6 = vpop.f32.mrf.mxu0 }
 0x137   :  { %1324 = vmatpush1.bf16.msra.mxu1 %v2843_v63  ;;  %2602 = vmatpush3.bf16.msra.mxu0 %v2847_v1  ;;  %v409_v45 = vmax.f32 %v399_v39, 0.0  ;;  %v2898_v63 = vld [vmem:[#allocation8 + $0x278] ss:$12 sps:$4 sm:$0xff]   ;;  %v2904_v6 = vld [vmem:[#allocation8 + $0x248] ss:$12 sps:$4 sm:$0xff]  }
 0x138   :  { %1398 = vmatprep.mubr.bf16.mxu0 %v416_v61  ;;  %1325 = vmatprep.subr.bf16.mxu1 %v2850_v3  ;;  %v401_v11 = vpop.f32.mrf.mxu0  ;;  %v2896_v61 = vld [vmem:[#allocation8 + $0x1d0] ss:$12 sps:$4 sm:$0xff]   ;;  %v2899_v1 = vld [vmem:[#allocation8 + $0x1b8] ss:$12 sps:$4 sm:$0xff]   ;;  %v2901_v3 = vld [vmem:[#allocation8 + $0x260] ss:$12 sps:$4 sm:$0xff]  }
 0x139   :  { %2603 = vmatprep.subr.bf16.mxu0 %v2851_v5  ;;  %1355 = vmatprep.mubr.bf16.mxu1 %v3236_v0  ;;  %v402_v40 = vadd.f32 %v401_v11, %v174_v34  ;;  %v2903_v5 = vld [vmem:[#allocation8 + $0x320] ss:$12 sps:$4 sm:$0xff]   ;;  %v2955_v39 = vld [vmem:[#allocation10 + $0x170] ss:$8 sps:$4 sm:$0xff]  }
 0x13a   :  { %v2685_v12 = vpop.f32.mrf.mxu0  ;;  %v2912_v11 = vld [vmem:[#allocation10 + $0x64] ss:$8 sps:$4 sm:$0xff]  }
 0x13b   :  { %1326 = vmatpush1.bf16.msra.mxu1 %v2848_v7  ;;  %2604 = vmatpush3.bf16.msra.mxu0 %v2852_v8  ;;  %v414_v29 = vmax.f32 %v402_v40, 0.0  ;;  %v2905_v7 = vld [vmem:[#allocation8 + $0x188] ss:$12 sps:$4 sm:$0xff]   ;;  %v2942_v34 = vld [vmem:[#allocation10 + $0xc4] ss:$8 sps:$4 sm:$0xff]  }
 0x13c   :  { %1327 = vmatprep.subr.bf16.mxu1 %v2855_v9  ;;  %2605 = vmatprep.subr.bf16.mxu0 %v2856_v10  ;;  %v2906_v8 = vld [vmem:[#allocation8 + $0x308] ss:$12 sps:$4 sm:$0xff]   ;;  %v2907_v10 = vld [vmem:[#allocation10 + $0x70] ss:$8 sps:$4 sm:$0xff]  }
 0x13d   :  { %v3380_v48 = vpack.c.bf16 %v414_v29, %v409_v45  ;;  %v2909_v9 = vld [vmem:[#allocation10 + $0x74] ss:$8 sps:$4 sm:$0xff]   ;;  %v2910_v12 = vld [vmem:[#allocation10 + $0x60] ss:$8 sps:$4 sm:$0xff]   ;;  %v2949_v29 = vld [vmem:[#allocation10 + $0x90] ss:$8 sps:$4 sm:$0xff]  }
 0x13e   :  { %v2957_v40 = vld [vmem:[#allocation10 + $0x174] ss:$8 sps:$4 sm:$0xff]  }
 0x13f   :  { %1328 = vmatpush1.bf16.msra.mxu1 %v2853_v13  ;;  %2606 = vmatpush3.bf16.msra.mxu0 %v2857_v14  ;;  %v2915_v13 = vld [vmem:[#allocation10 + $0x54] ss:$8 sps:$4 sm:$0xff]   ;;  %v2913_v14 = vld [vmem:[#allocation10 + $0x50] ss:$8 sps:$4 sm:$0xff]  }
 0x140   :  { %1329 = vmatprep.subr.bf16.mxu1 %v2860_v15  ;;  %2607 = vmatprep.subr.bf16.mxu0 %v2861_v16  ;;  %v2918_v15 = vld [vmem:[#allocation10 + $0x44] ss:$8 sps:$4 sm:$0xff]   ;;  %v2921_v16 = vld [vmem:[#allocation10 + $0x34] ss:$8 sps:$4 sm:$0xff]  }
 0x141   :  { %v2963_v45 = vld [vmem:[#allocation10 + $0x154] ss:$8 sps:$4 sm:$0xff]  }
 0x143   :  { %1330 = vmatpush1.bf16.msra.mxu1 %v2858_v17  ;;  %2608 = vmatpush3.bf16.msra.mxu0 %v2862_v19  ;;  %v2919_v17 = vld [vmem:[#allocation10 + $0x30] ss:$8 sps:$4 sm:$0xff]   ;;  %v2922_v19 = vld [vmem:[#allocation10 + $0x20] ss:$8 sps:$4 sm:$0xff]  }
 0x144   :  { %1331 = vmatprep.subr.bf16.mxu1 %v2865_v20  ;;  %2609 = vmatprep.subr.bf16.mxu0 %v2866_v21  ;;  %v2927_v20 = vld [vmem:[#allocation10 + $0x14] ss:$8 sps:$4 sm:$0xff]   ;;  %v2925_v21 = vld [vmem:[#allocation10 + $0x10] ss:$8 sps:$4 sm:$0xff]  }
 0x147   :  { %1332 = vmatpush1.bf16.msra.mxu1 %v2863_v22  ;;  %2610 = vmatpush3.bf16.msra.mxu0 %v2867_v23  ;;  %v2928_v22 = vld [vmem:[#allocation10] ss:$8 sps:$4 sm:$0xff]   ;;  %v2933_v23 = vld [vmem:[#allocation10 + $0xf4] ss:$8 sps:$4 sm:$0xff]  }
 0x148   :  { %1333 = vmatprep.subr.bf16.mxu1 %v2870_v25  ;;  %2611 = vmatprep.subr.bf16.mxu0 %v2871_v28  ;;  %v2936_v25 = vld [vmem:[#allocation10 + $0xe4] ss:$8 sps:$4 sm:$0xff]   ;;  %v2934_v28 = vld [vmem:[#allocation10 + $0xe0] ss:$8 sps:$4 sm:$0xff]  }
 0x14b   :  { %1334 = vmatpush1.bf16.msra.mxu1 %v2868_v32  ;;  %2612 = vmatpush3.bf16.msra.mxu0 %v2872_v33  ;;  %v2939_v32 = vld [vmem:[#allocation10 + $0xd4] ss:$8 sps:$4 sm:$0xff]   ;;  %v2937_v33 = vld [vmem:[#allocation10 + $0xd0] ss:$8 sps:$4 sm:$0xff]  }
 0x14c   :  { %1335 = vmatprep.subr.bf16.mxu1 %v2875_v35  ;;  %2613 = vmatprep.subr.bf16.mxu0 %v2876_v36  ;;  %v2940_v35 = vld [vmem:[#allocation10 + $0xc0] ss:$8 sps:$4 sm:$0xff]   ;;  %v2945_v36 = vld [vmem:[#allocation10 + $0xb4] ss:$8 sps:$4 sm:$0xff]  }
 0x14f   :  { %1336 = vmatpush1.bf16.msra.mxu1 %v2873_v37  ;;  %2614 = vmatpush3.bf16.msra.mxu0 %v2877_v38  ;;  %v2943_v37 = vld [vmem:[#allocation10 + $0xb0] ss:$8 sps:$4 sm:$0xff]   ;;  %v2948_v38 = vld [vmem:[#allocation10 + $0xa4] ss:$8 sps:$4 sm:$0xff]  }
 0x150   :  { %1337 = vmatprep.subr.bf16.mxu1 %v2880_v41  ;;  %2615 = vmatprep.subr.bf16.mxu0 %v2881_v42  ;;  %v2960_v41 = vld [vmem:[#allocation10 + $0x164] ss:$8 sps:$4 sm:$0xff]   ;;  %v2946_v42 = vld [vmem:[#allocation10 + $0xa0] ss:$8 sps:$4 sm:$0xff]  }
 0x153   :  { %1338 = vmatpush1.bf16.msra.mxu1 %v2878_v43  ;;  %2616 = vmatpush3.bf16.msra.mxu0 %v2882_v44  ;;  %v2958_v43 = vld [vmem:[#allocation10 + $0x160] ss:$8 sps:$4 sm:$0xff]   ;;  %v2951_v44 = vld [vmem:[#allocation10 + $0x94] ss:$8 sps:$4 sm:$0xff]  }
 0x154   :  { %2623 = vmatprep.subr.bf16.mxu1 %v2883_v46  ;;  %2686 = vmatprep.subr.bf16.mxu0 %v3237_v18  ;;  %v2961_v46 = vld [vmem:[#allocation10 + $0x150] ss:$8 sps:$4 sm:$0xff]  }
 0x156   :  { %1356 = vmatmul.mubr.bf16.vlgmr.msra.gmra.mxu1 %v3380_v48  ;;  %1399 = vmatmul.mubr.bf16.vlgmr.msra.gmra.mxu0 %v3372_v2  ;;  %v2900_v2 = vld [vmem:[#allocation8 + $0x338] ss:$12 sps:$4 sm:$0xff]  }
 0x157   :  { %2624 = vmatpush3.bf16.msra.mxu1 %v2884_v47  ;;  %1439 = vmatprep.mubr.bf16.mxu1 %v3370_v62  ;;  %v2897_v62 = vld [vmem:[#allocation8 + $0x350] ss:$12 sps:$4 sm:$0xff]   ;;  %v2954_v47 = vld [vmem:[#allocation10 + $0x84] ss:$8 sps:$4 sm:$0xff]  }
 0x158   :  { %2687 = vmatpush3.bf16.msra.mxu0 %v2885_v49  ;;  %2625 = vmatprep.subr.bf16.mxu1 %v2886_v50  ;;  %v2952_v49 = vld [vmem:[#allocation10 + $0x80] ss:$8 sps:$4 sm:$0xff]  }
 0x159   :  { %2688 = vmatprep.subr.bf16.mxu0 %v3237_v18  ;;  %2702 = vmatprep.mubr.msk.bf16.mxu0 %vm3238_vm2, %v3237_v18  ;;  %v2964_v50 = vld [vmem:[#allocation10 + $0x140] ss:$8 sps:$4 sm:$0xff]  }
 0x15b   :  { %2626 = vmatpush3.bf16.msra.mxu1 %v2887_v51  ;;  %v2969_v51 = vld [vmem:[#allocation10 + $0x134] ss:$8 sps:$4 sm:$0xff]  }
 0x15c   :  { %2689 = vmatpush3.bf16.msra.mxu0 %v2888_v52  ;;  %2627 = vmatprep.subr.bf16.mxu1 %v2889_v53  ;;  %v2967_v52 = vld [vmem:[#allocation10 + $0x130] ss:$8 sps:$4 sm:$0xff]   ;;  %v2972_v53 = vld [vmem:[#allocation10 + $0x124] ss:$8 sps:$4 sm:$0xff]  }
 0x15d   :  { %2690 = vmatprep.subr.bf16.mxu0 %v3237_v18 }
 0x15f   :  { %2628 = vmatpush3.bf16.msra.mxu1 %v2890_v54  ;;  %v2970_v54 = vld [vmem:[#allocation10 + $0x120] ss:$8 sps:$4 sm:$0xff]  }
 0x160   :  { %2691 = vmatpush3.bf16.msra.mxu0 %v2891_v55  ;;  %2629 = vmatprep.subr.bf16.mxu1 %v2892_v56  ;;  %v2975_v55 = vld [vmem:[#allocation10 + $0x114] ss:$8 sps:$4 sm:$0xff]   ;;  %v2973_v56 = vld [vmem:[#allocation10 + $0x110] ss:$8 sps:$4 sm:$0xff]  }
 0x161   :  { %2692 = vmatprep.subr.bf16.mxu0 %v3237_v18 }
 0x163   :  { %2630 = vmatpush3.bf16.msra.mxu1 %v2893_v57  ;;  %v2978_v57 = vld [vmem:[#allocation10 + $0x104] ss:$8 sps:$4 sm:$0xff]  }
 0x164   :  { %2693 = vmatpush3.bf16.msra.mxu0 %v2894_v58  ;;  %2631 = vmatprep.subr.bf16.mxu1 %v2895_v59  ;;  %v2976_v58 = vld [vmem:[#allocation10 + $0x100] ss:$8 sps:$4 sm:$0xff]   ;;  %v2981_v59 = vld [vmem:[#allocation11 + $0x74] ss:$8 sps:$4 sm:$0xff]  }
 0x165   :  { %2694 = vmatprep.subr.bf16.mxu0 %v3237_v18 }
 0x167   :  { %2632 = vmatpush3.bf16.msra.mxu1 %v2896_v61 }
 0x168   :  { %2695 = vmatpush3.bf16.msra.mxu0 %v2897_v62  ;;  %2633 = vmatprep.subr.bf16.mxu1 %v2898_v63 }
 0x169   :  { %2696 = vmatprep.subr.bf16.mxu0 %v3237_v18 }
 0x16b   :  { %2634 = vmatpush3.bf16.msra.mxu1 %v2899_v1  ;;  %v580_v1 = vld [vmem:[%s3428_s4] sm:$0x7] }
 0x16c   :  { %2697 = vmatpush3.bf16.msra.mxu0 %v2900_v2  ;;  %2635 = vmatprep.subr.bf16.mxu1 %v2901_v3  ;;  %v589_v3 = vrot.slane %v580_v1, %v3355_v30 }
 0x16d   :  { %2698 = vmatprep.subr.bf16.mxu0 %v3237_v18 }
 0x16f   :  { %2636 = vmatpush3.bf16.msra.mxu1 %v2902_v4  ;;  %v585_v4 = vrot.slane %v580_v1, %v3358_v31 }
 0x170   :  { %2699 = vmatpush3.bf16.msra.mxu0 %v2903_v5  ;;  %2637 = vmatprep.subr.bf16.mxu1 %v2904_v6 }
 0x171   :  { %2700 = vmatprep.subr.bf16.mxu0 %v3237_v18  ;;  %v2916_v18 = vld [vmem:[#allocation10 + $0x40] ss:$8 sps:$4 sm:$0xff]  }
 0x173   :  { %2638 = vmatpush3.bf16.msra.mxu1 %v2905_v7 }
 0x174   :  { %2701 = vmatpush3.bf16.msra.mxu0 %v2906_v8  ;;  %1798 = vmatprep.subr.bf16.mxu1 %v2909_v9 }
 0x175   :  { %1841 = vmatprep.subr.bf16.mxu0 %v2957_v40 }
 0x176   :  { %1440 = vmatmul.mubr.bf16.vlgmr.msra.gmra.mxu1 %v3368_v60  ;;  %v2924_v60 = vld [vmem:[#allocation10 + $0x24] ss:$8 sps:$4 sm:$0xff]  }
 0x177   :  { %2703 = vmatmul.mubr.bf16.vlgmr.msra.gmra.mxu0 %v3380_v48  ;;  %1799 = vmatpush1.bf16.msra.mxu1 %v2907_v10  ;;  %v2966_v48 = vld [vmem:[#allocation10 + $0x144] ss:$8 sps:$4 sm:$0xff]  }
 0x178   :  { %1800 = vmatprep.subr.bf16.mxu1 %v2912_v11  ;;  %1873 = vmatprep.mubr.bf16.mxu0 %v3236_v0  ;;  %v2930_v0 = vld [vmem:[#allocation10 + $0x4] ss:$8 sps:$4 sm:$0xff]  }
 0x179   :  { %1842 = vmatpush1.bf16.msra.mxu0 %v2955_v39 }
 0x17a   :  { %1843 = vmatprep.subr.bf16.mxu0 %v2960_v41 }
 0x17b   :  { %1801 = vmatpush1.bf16.msra.mxu1 %v2910_v12 }
 0x17c   :  { %1802 = vmatprep.subr.bf16.mxu1 %v2915_v13 }
 0x17d   :  { %1844 = vmatpush1.bf16.msra.mxu0 %v2958_v43 }
 0x17e   :  { %1845 = vmatprep.subr.bf16.mxu0 %v2963_v45 }
 0x17f   :  { %1803 = vmatpush1.bf16.msra.mxu1 %v2913_v14 }
 0x180   :  { %1804 = vmatprep.subr.bf16.mxu1 %v2918_v15 }
 0x181   :  { %1846 = vmatpush1.bf16.msra.mxu0 %v2961_v46 }
 0x182   :  { %1847 = vmatprep.subr.bf16.mxu0 %v2966_v48 }
 0x183   :  { %1805 = vmatpush1.bf16.msra.mxu1 %v2916_v18 }
 0x184   :  { %1806 = vmatprep.subr.bf16.mxu1 %v2921_v16 }
 0x185   :  { %1848 = vmatpush1.bf16.msra.mxu0 %v2964_v50 }
 0x186   :  { %1849 = vmatprep.subr.bf16.mxu0 %v2969_v51 }
 0x187   :  { %1807 = vmatpush1.bf16.msra.mxu1 %v2919_v17 }
 0x188   :  { %1808 = vmatprep.subr.bf16.mxu1 %v2924_v60 }
 0x189   :  { %1850 = vmatpush1.bf16.msra.mxu0 %v2967_v52 }
 0x18a   :  { %1851 = vmatprep.subr.bf16.mxu0 %v2972_v53 }
 0x18b   :  { %1809 = vmatpush1.bf16.msra.mxu1 %v2922_v19 }
 0x18c   :  { %1810 = vmatprep.subr.bf16.mxu1 %v2927_v20 }
 0x18d   :  { %1852 = vmatpush1.bf16.msra.mxu0 %v2970_v54 }
 0x18e   :  { %1853 = vmatprep.subr.bf16.mxu0 %v2975_v55 }
 0x18f   :  { %1811 = vmatpush1.bf16.msra.mxu1 %v2925_v21 }
 0x190   :  { %1812 = vmatprep.subr.bf16.mxu1 %v2930_v0 }
 0x191   :  { %1854 = vmatpush1.bf16.msra.mxu0 %v2973_v56  ;;  %v2979_v56 = vld [vmem:[#allocation11 + $0x70] ss:$8 sps:$4 sm:$0xff]  }
 0x192   :  { %1855 = vmatprep.subr.bf16.mxu0 %v2978_v57 }
 0x193   :  { %1813 = vmatpush1.bf16.msra.mxu1 %v2928_v22 }
 0x194   :  { %1814 = vmatprep.subr.bf16.mxu1 %v2933_v23 }
 0x195   :  { %1856 = vmatpush1.bf16.msra.mxu0 %v2976_v58  ;;  %v2984_v58 = vld [vmem:[#allocation11 + $0x64] ss:$8 sps:$4 sm:$0xff]  }
 0x196   :  { %2094 = vmatprep.subr.bf16.mxu0 %v2981_v59  ;;  %v2982_v59 = vld [vmem:[#allocation11 + $0x60] ss:$8 sps:$4 sm:$0xff]  }
 0x197   :  { %1815 = vmatpush2.bf16.msra.mxu1 %v2931_v24 }
 0x198   :  { %1816 = vmatprep.subr.bf16.mxu1 %v2936_v25 }
 0x19b   :  { %1817 = vmatpush2.bf16.msra.mxu1 %v2934_v28 }
 0x19c   :  { %1818 = vmatprep.subr.bf16.mxu1 %v2939_v32 }
 0x19f   :  { %1819 = vmatpush2.bf16.msra.mxu1 %v2937_v33 }
 0x1a0   :  { %1820 = vmatprep.subr.bf16.mxu1 %v2942_v34 }
 0x1a3   :  { %1821 = vmatpush2.bf16.msra.mxu1 %v2940_v35 }
 0x1a4   :  { %1822 = vmatprep.subr.bf16.mxu1 %v2945_v36 }
 0x1a7   :  { %1823 = vmatpush2.bf16.msra.mxu1 %v2943_v37  ;;  %v593_v37 = vrot.slane %v580_v1, %v165_v27  ;;  %v2988_v1 = vld [vmem:[#allocation11 + $0x40] ss:$8 sps:$4 sm:$0xff]  }
 0x1a8   :  { %1824 = vmatprep.subr.bf16.mxu1 %v2948_v38 }
 0x1ab   :  { %1825 = vmatpush2.bf16.msra.mxu1 %v2946_v42 }
 0x1ac   :  { %1826 = vmatprep.subr.bf16.mxu1 %v2951_v44 }
 0x1af   :  { %1827 = vmatpush2.bf16.msra.mxu1 %v2949_v29 }
 0x1b0   :  { %1828 = vmatprep.subr.bf16.mxu1 %v2954_v47 }
 0x1b3   :  { %1829 = vmatpush2.bf16.msra.mxu1 %v2952_v49 }
 0x1f6   :  { %v1271_v61 = vpop.f32.mrf.mxu1  ;;  %v1314_v63 = vpop.f32.mrf.mxu0 }
 0x1f7   :  { %v1272_v9 = vadd.f32 %v1271_v61, %v585_v4  ;;  %v2987_v61 = vld [vmem:[#allocation11 + $0x54] ss:$8 sps:$4 sm:$0xff]  }
 0x1f8   :  { %v1273_v62 = vpop.f32.mrf.mxu1  ;;  %v1316_v5 = vpop.f32.mrf.mxu0 }
 0x1f9   :  { %v1274_v7 = vadd.f32 %v1273_v62, %v589_v3  ;;  %v1315_v18 = vadd.f32 %v1314_v63, %v1272_v9  ;;  %v2985_v62 = vld [vmem:[#allocation11 + $0x50] ss:$8 sps:$4 sm:$0xff]   ;;  %v2990_v63 = vld [vmem:[#allocation11 + $0x44] ss:$8 sps:$4 sm:$0xff]   ;;  %v3000_v9 = vld [vmem:[#allocation11] ss:$8 sps:$4 sm:$0xff]  }
 0x1fa   :  { %v1275_v2 = vpop.f32.mrf.mxu1  ;;  %v1318_v10 = vpop.f32.mrf.mxu0 }
 0x1fb   :  { %v1276_v8 = vadd.f32 %v1275_v2, %v585_v4  ;;  %v1317_v14 = vadd.f32 %v1316_v5, %v1274_v7  ;;  %v2993_v2 = vld [vmem:[#allocation11 + $0x34] ss:$8 sps:$4 sm:$0xff]   ;;  %v2996_v4 = vld [vmem:[#allocation11 + $0x24] ss:$8 sps:$4 sm:$0xff]   ;;  %v2994_v5 = vld [vmem:[#allocation11 + $0x20] ss:$8 sps:$4 sm:$0xff]  }
 0x1fc   :  { %v1277_v6 = vpop.f32.mrf.mxu1  ;;  %v1320_v16 = vpop.f32.mrf.mxu0  ;;  %v2999_v7 = vld [vmem:[#allocation11 + $0x14] ss:$8 sps:$4 sm:$0xff]  }
 0x1fd   :  { %v1278_v12 = vadd.f32 %v1277_v6, %v589_v3  ;;  %v1319_v15 = vadd.f32 %v1318_v10, %v1276_v8  ;;  %v2991_v3 = vld [vmem:[#allocation11 + $0x30] ss:$8 sps:$4 sm:$0xff]   ;;  %v3002_v8 = vld [vmem:[#allocation11 + $0x4] ss:$8 sps:$4 sm:$0xff]   ;;  %v3005_v10 = vld [vmem:[#allocation11 + $0xf4] ss:$8 sps:$4 sm:$0xff]  }
 0x1fe   :  { %v2997_v6 = vld [vmem:[#allocation11 + $0x10] ss:$8 sps:$4 sm:$0xff]  }
 0x1ff   :  { %v1321_v60 = vadd.f32 %v1320_v16, %v1278_v12  ;;  %v3008_v12 = vld [vmem:[#allocation11 + $0xe4] ss:$8 sps:$4 sm:$0xff]   ;;  %v3012_v16 = vld [vmem:[#allocation11 + $0xc0] ss:$8 sps:$4 sm:$0xff]  }
 0x216   :  { %v1357_v11 = vpop.f32.mrf.mxu1  ;;  %v2617_v34 = vpop.f32.mrf.mxu0 }
 0x217   :  { %v1358_v21 = vadd.f32 %v1357_v11, %v1315_v18  ;;  %v3003_v11 = vld [vmem:[#allocation11 + $0xf0] ss:$8 sps:$4 sm:$0xff]   ;;  %v3014_v18 = vld [vmem:[#allocation11 + $0xc4] ss:$8 sps:$4 sm:$0xff]  }
 0x218   :  { %v1359_v13 = vpop.f32.mrf.mxu1  ;;  %v2618_v35 = vpop.f32.mrf.mxu0 }
 0x219   :  { %v1360_v19 = vadd.f32 %v1359_v13, %v1317_v14  ;;  %v1489_v28 = vmax.f32 %v1358_v21, 0.0  ;;  %v2619_v38 = vadd.f32 %v2618_v35, %v2617_v34  ;;  %v3006_v13 = vld [vmem:[#allocation11 + $0xe0] ss:$8 sps:$4 sm:$0xff]   ;;  %v3011_v14 = vld [vmem:[#allocation11 + $0xd4] ss:$8 sps:$4 sm:$0xff]  }
 0x21a   :  { %v1361_v17 = vpop.f32.mrf.mxu1  ;;  %v2620_v36 = vpop.f32.mrf.mxu0  ;;  %v3023_v21 = vld [vmem:[#allocation11 + $0x94] ss:$8 sps:$4 sm:$0xff]   ;;  %v3032_v34 = vld [vmem:[#allocation13 + $0x28] sm:$0xff]   ;;  %v3033_v35 = vld [vmem:[#allocation13 + $0x60] sm:$0xff]  }
 0x21b   :  { %v1362_v20 = vadd.f32 %v1361_v17, %v1319_v15  ;;  %v1490_v24 = vmax.f32 %v1360_v19, 0.0  ;;  %v1401_v43 = vadd.f32 %v2619_v38, %v593_v37  ;;  %v3009_v15 = vld [vmem:[#allocation11 + $0xd0] ss:$8 sps:$4 sm:$0xff]   ;;  %v3017_v17 = vld [vmem:[#allocation11 + $0xb4] ss:$8 sps:$4 sm:$0xff]  }
 0x21c   :  { %v1363_v0 = vpop.f32.mrf.mxu1  ;;  %v2621_v39 = vpop.f32.mrf.mxu0  ;;  %v3020_v19 = vld [vmem:[#allocation11 + $0xa4] ss:$8 sps:$4 sm:$0xff]   ;;  %v3036_v38 = vld [vmem:[#allocation13 + $0x18] sm:$0xff]  }
 0x21d   :  { %v1364_v22 = vadd.f32 %v1363_v0, %v1321_v60  ;;  %v1492_v23 = vmax.f32 %v1362_v20, 0.0  ;;  %v2622_v44 = vadd.f32 %v2621_v39, %v2620_v36  ;;  %v3015_v60 = vld [vmem:[#allocation11 + $0xb0] ss:$8 sps:$4 sm:$0xff]   ;;  %v3018_v20 = vld [vmem:[#allocation11 + $0xa0] ss:$8 sps:$4 sm:$0xff]  }
 0x21e   :  { %v3021_v0 = vld [vmem:[#allocation11 + $0x90] ss:$8 sps:$4 sm:$0xff]   ;;  %v3034_v36 = vld [vmem:[#allocation13 + $0x20] sm:$0xff]  }
 0x21f   :  { %v1493_v25 = vmax.f32 %v1364_v22, 0.0  ;;  %v1495_v33 = vpack.c.bf16 %v1492_v23, %v1489_v28  ;;  %v1404_v50 = vadd.f32 %v2622_v44, %v593_v37  ;;  %v3026_v22 = vld [vmem:[#allocation11 + $0x84] ss:$8 sps:$4 sm:$0xff]   ;;  %v3024_v23 = vld [vmem:[#allocation11 + $0x80] ss:$8 sps:$4 sm:$0xff]   ;;  %v3029_v28 = vld [vmem:[#allocation13 + $0x70] sm:$0xff]  }
 0x220   :  { %v3035_v37 = vld [vmem:[#allocation13 + $0x58] sm:$0xff]  }
 0x221   :  { %v1496_v32 = vpack.c.bf16 %v1493_v25, %v1490_v24  ;;  %v3027_v24 = vld [vmem:[#allocation13 + $0x78] sm:$0xff]  }
 0x222   :  { %v3028_v25 = vld [vmem:[#allocation13 + $0x38] sm:$0xff]   ;;  %2654 = vmatprep.subr.bf16.mxu1 %v3027_v24 }
 0x223   :  { %1830 = vmatprep.mubr.bf16.mxu1 %v1496_v32  ;;  %v3030_v32 = vld [vmem:[#allocation13 + $0x30] sm:$0xff]  }
 0x224   :  { %1831 = vmatmul.mubr.bf16.vlgmr.msra.gmra.mxu1 %v1495_v33  ;;  %v3031_v33 = vld [vmem:[#allocation13 + $0x68] sm:$0xff]  }
 0x225   :  { %2655 = vmatpush3.bf16.msra.mxu1 %v3028_v25 }
 0x226   :  { %2656 = vmatprep.subr.bf16.mxu1 %v3029_v28 }
 0x229   :  { %2657 = vmatpush3.bf16.msra.mxu1 %v3030_v32 }
 0x22a   :  { %2658 = vmatprep.subr.bf16.mxu1 %v3031_v33 }
 0x22d   :  { %2659 = vmatpush3.bf16.msra.mxu1 %v3032_v34 }
 0x22e   :  { %2660 = vmatprep.subr.bf16.mxu1 %v3033_v35 }
 0x231   :  { %2661 = vmatpush3.bf16.msra.mxu1 %v3034_v36 }
 0x232   :  { %2662 = vmatprep.subr.bf16.mxu1 %v3035_v37 }
 0x235   :  { %2663 = vmatpush3.bf16.msra.mxu1 %v3036_v38 }
 0x236   :  { %v2639_v40 = vpop.f32.mrf.mxu1 }
 0x237   :  { %v1482_v41 = vpop.f32.mrf.mxu0 }
 0x238   :  { %v2640_v42 = vpop.f32.mrf.mxu1 }
 0x239   :  { %v2641_v45 = vadd.f32 %v2640_v42, %v2639_v40  ;;  %v2704_v29 = vpop.f32.mrf.mxu0 }
 0x23a   :  { %v2642_v46 = vpop.f32.mrf.mxu1 }
 0x23b   :  { %v1442_v47 = vadd.f32 %v2641_v45, %v1401_v43  ;;  %v1485_v48 = vpop.f32.mrf.mxu0 }
 0x23c   :  { %v2643_v49 = vpop.f32.mrf.mxu1 }
 0x23d   :  { %v2644_v51 = vadd.f32 %v2643_v49, %v2642_v46  ;;  %v2705_v52 = vpop.f32.mrf.mxu0  ;;  %v1483_v53 = vadd.f32 %v1482_v41, %v1442_v47  ;;  %v1546_v41 = vld [vmem:[%s3430_s6] sm:$0x3] }
 0x23e   :  { %v1555_v43 = vrot.slane %v1546_v41, %v3355_v30  ;;  %v1551_v44 = vrot.slane %v1546_v41, %v3358_v31 }
 0x23f   :  { %v1445_v54 = vadd.f32 %v2644_v51, %v1404_v50  ;;  %v1491_v27 = vmax.f32 %v1483_v53, 0.0 }
 0x241   :  { %v1486_v26 = vadd.f32 %v1485_v48, %v1445_v54 }
 0x243   :  { %v1494_v55 = vmax.f32 %v1486_v26, 0.0 }
 0x245   :  { %v1497_v57 = vpack.c.bf16 %v1494_v55, %v1491_v27 }
 0x247   :  { %1874 = vmatmul.mubr.bf16.vlgmr.msra.gmra.mxu0 %v1497_v57 }
 0x248   :  { %2095 = vmatpush1.bf16.msra.mxu0 %v2979_v56 }
 0x249   :  { %2096 = vmatprep.subr.bf16.mxu0 %v2984_v58 }
 0x24c   :  { %2097 = vmatpush1.bf16.msra.mxu0 %v2982_v59 }
 0x24d   :  { %2098 = vmatprep.subr.bf16.mxu0 %v2987_v61 }
 0x250   :  { %2099 = vmatpush1.bf16.msra.mxu0 %v2985_v62  ;;  %v3037_v62 = vld [vmem:[#allocation13 + $0x50] sm:$0xff]  }
 0x251   :  { %2100 = vmatprep.subr.bf16.mxu0 %v2990_v63  ;;  %v3038_v63 = vld [vmem:[#allocation13 + $0x10] sm:$0xff]   ;;  %2664 = vmatprep.subr.bf16.mxu1 %v3037_v62 }
 0x252   :  { %2665 = vmatpush3.bf16.msra.mxu1 %v3038_v63 }
 0x254   :  { %2101 = vmatpush1.bf16.msra.mxu0 %v2988_v1  ;;  %v3039_v1 = vld [vmem:[#allocation13 + $0x48] sm:$0xff]  }
 0x255   :  { %2102 = vmatprep.subr.bf16.mxu0 %v2993_v2  ;;  %v3040_v2 = vld [vmem:[#allocation13 + $0x8] sm:$0xff]   ;;  %2666 = vmatprep.subr.bf16.mxu1 %v3039_v1 }
 0x256   :  { %2667 = vmatpush3.bf16.msra.mxu1 %v3040_v2 }
 0x258   :  { %2103 = vmatpush1.bf16.msra.mxu0 %v2991_v3  ;;  %v3041_v3 = vld [vmem:[#allocation13 + $0x40] sm:$0xff]  }
 0x259   :  { %2104 = vmatprep.subr.bf16.mxu0 %v2996_v4  ;;  %v3042_v4 = vld [vmem:[#allocation13] sm:$0xff]   ;;  %2668 = vmatprep.subr.bf16.mxu1 %v3041_v3 }
 0x25a   :  { %2669 = vmatpush3.bf16.msra.mxu1 %v3042_v4 }
 0x25c   :  { %2105 = vmatpush1.bf16.msra.mxu0 %v2994_v5  ;;  %v1922_v5 = vld [vmem:[%s3432_s8] sm:$0x3] }
 0x25d   :  { %2106 = vmatprep.subr.bf16.mxu0 %v2999_v7  ;;  %v1931_v7 = vrot.slane %v1922_v5, %v3355_v30  ;;  %v2580_v30 = vld [vmem:[%s3434_s10] ss:$0 sm:$0xff]  ;;  %s3239_s10 = smov [#allocation14]  }
 0x25e   :  { %s2344_s21 = sshll.u32 %s3239_s10, 4  ;;  %s2345_s21 = int_to_ptr.vmem [resolvable:$true] %s2344_s21 }
 0x25f   :  { %s3191_s22 = scalar_lea.vmem %s2345_s21, 256  ;;  %p3196_p8 = scmp.lt.s32.totalorder %s2345_s21, %s2345_s21 }
 0x260   :  { %2107 = vmatpush1.bf16.msra.mxu0 %v2997_v6  ;;  %p3192_p7 = scmp.ne.s32.totalorder %s2345_s21, %s3191_s22  ;;  %p3197_p9 = scmp.lt.s32.totalorder %s3191_s22, %s3191_s22 }
 0x261   :  { %2108 = vmatprep.subr.bf16.mxu0 %v3002_v8  ;;  %v1927_v8 = vrot.slane %v1922_v5, %v3358_v31 }
 0x262   :  { %p3198_p10 = por %p3197_p9, %p3196_p8 }
 0x264   :  { %2109 = vmatpush1.bf16.msra.mxu0 %v3000_v9  ;;  %p3199_p11 = pnand %p3198_p10, %p3192_p7 }
 0x265   :  { %2110 = vmatprep.subr.bf16.mxu0 %v3005_v10 }
 0x268   :  { %2111 = vmatpush2.bf16.msra.mxu0 %v3003_v11 }
 0x269   :  { %2112 = vmatprep.subr.bf16.mxu0 %v3008_v12 }
 0x26c   :  { %2113 = vmatpush2.bf16.msra.mxu0 %v3006_v13 }
 0x26d   :  { %2114 = vmatprep.subr.bf16.mxu0 %v3011_v14 }
 0x270   :  { %2115 = vmatpush2.bf16.msra.mxu0 %v3009_v15 }
 0x271   :  { %2116 = vmatprep.subr.bf16.mxu0 %v3014_v18 }
 0x274   :  { %2117 = vmatpush2.bf16.msra.mxu0 %v3012_v16 }
 0x275   :  { %2118 = vmatprep.subr.bf16.mxu0 %v3017_v17 }
 0x278   :  { %2119 = vmatpush2.bf16.msra.mxu0 %v3015_v60 }
 0x279   :  { %2120 = vmatprep.subr.bf16.mxu0 %v3020_v19 }
 0x27c   :  { %2121 = vmatpush2.bf16.msra.mxu0 %v3018_v20 }
 0x27d   :  { %2122 = vmatprep.subr.bf16.mxu0 %v3023_v21 }
 0x280   :  { %2123 = vmatpush2.bf16.msra.mxu0 %v3021_v0 }
 0x281   :  { %2124 = vmatprep.subr.bf16.mxu0 %v3026_v22 }
 0x284   :  { %2125 = vmatpush2.bf16.msra.mxu0 %v3024_v23 }
 0x2e4   :  { %v1832_v39 = vpop.f32.mrf.mxu1 }
 0x2e5   :  { %v1833_v49 = vadd.f32 %v1832_v39, %v1551_v44 }
 0x2e6   :  { %v1834_v40 = vpop.f32.mrf.mxu1 }
 0x2e7   :  { %v1835_v47 = vadd.f32 %v1834_v40, %v1555_v43 }
 0x2e8   :  { %v1836_v42 = vpop.f32.mrf.mxu1 }
 0x2e9   :  { %v1837_v48 = vadd.f32 %v1836_v42, %v1551_v44 }
 0x2ea   :  { %v1838_v29 = vpop.f32.mrf.mxu1 }
 0x2eb   :  { %v1839_v51 = vadd.f32 %v1838_v29, %v1555_v43 }
 0x307   :  { %v1875_v45 = vpop.f32.mrf.mxu0 }
 0x308   :  { %v1876_v54 = vadd.f32 %v1875_v45, %v1833_v49 }
 0x309   :  { %v1877_v46 = vpop.f32.mrf.mxu0 }
 0x30a   :  { %v1878_v52 = vadd.f32 %v1877_v46, %v1835_v47  ;;  %v1884_v58 = vmax.f32 %v1876_v54, 0.0 }
 0x30b   :  { %v1879_v50 = vpop.f32.mrf.mxu0 }
 0x30c   :  { %v1880_v53 = vadd.f32 %v1879_v50, %v1837_v48  ;;  %v1885_v56 = vmax.f32 %v1878_v52, 0.0 }
 0x30d   :  { %v1881_v26 = vpop.f32.mrf.mxu0 }
 0x30e   :  { %v1882_v27 = vadd.f32 %v1881_v26, %v1839_v51  ;;  %v1886_v55 = vmax.f32 %v1880_v53, 0.0 }
 0x310   :  { %v1887_v57 = vmax.f32 %v1882_v27, 0.0  ;;  %v1888_v61 = vpack.c.bf16 %v1886_v55, %v1884_v58 }
 0x312   :  { %v1889_v59 = vpack.c.bf16 %v1887_v57, %v1885_v56 }
 0x314   :  { %2126 = vmatprep.mubr.bf16.mxu0 %v1889_v59 }
 0x315   :  { %2127 = vmatmul.mubr.bf16.vlgmr.msra.gmra.mxu0 %v1888_v61 }
 0x3d5   :  { %v2128_v6 = vpop.f32.mrf.mxu0 }
 0x3d6   :  { %v2129_v13 = vadd.f32 %v2128_v6, %v1927_v8 }
 0x3d7   :  { %v2130_v9 = vpop.f32.mrf.mxu0 }
 0x3d8   :  { %v2131_v11 = vadd.f32 %v2130_v9, %v1931_v7  ;;  %v2137_v60 = vmax.f32 %v2129_v13, 0.0 }
 0x3d9   :  { %v2132_v10 = vpop.f32.mrf.mxu0 }
 0x3da   :  { %v2133_v12 = vadd.f32 %v2132_v10, %v1927_v8  ;;  %v2138_v16 = vmax.f32 %v2131_v11, 0.0 }
 0x3db   :  { %v2134_v14 = vpop.f32.mrf.mxu0 }
 0x3dc   :  { %v2135_v15 = vadd.f32 %v2134_v14, %v1931_v7  ;;  %v2139_v18 = vmax.f32 %v2133_v12, 0.0 }
 0x3de   :  { %v2140_v17 = vmax.f32 %v2135_v15, 0.0  ;;  %v2141_v20 = vpack.c.bf16 %v2139_v18, %v2137_v60 }
 0x3e0   :  { %v2142_v19 = vpack.c.bf16 %v2140_v17, %v2138_v16 }
 0x3e2   :  { %2310 = vmatprep.mubr.bf16.mxu1 %v2142_v19 }
 0x3e3   :  { %2311 = vmatmul.mubr.bf16.vlgmr.msra.gmra.mxu1 %v2141_v20 }
 0x4a3   :  { %v2670_v21 = vpop.f32.mrf.mxu1 }
 0x4a5   :  { %v2671_v0 = vpop.f32.mrf.mxu1 }
 0x4a6   :  { %v2672_v31 = vadd.f32 %v2671_v0, %v2670_v21 }
 0x4a7   :  { %v2673_v22 = vpop.f32.mrf.mxu1 }
 0x4a8   :  { %v2313_v23 = vadd.f32 %v2672_v31, %v2580_v30 }
 0x4a9   :  { %v2674_v24 = vpop.f32.mrf.mxu1 }
 0x4aa   :  { %v2675_v25 = vadd.f32 %v2674_v24, %v2673_v22  ;;  %2319 = vmax.xlane.f32.xlu0 %v2313_v23 }
 0x4ac   :  { %v2316_v28 = vadd.f32 %v2675_v25, %v2580_v30 }
 0x4ae   :  { %2321 = vmax.xlane.f32.xlu0 %v2316_v28 }
 0x533   :  { %v2320_v32 = vpop.xlane.xlu0 %2319 }
 0x534   :  { %v2323_v33 = vsub.f32 %v2313_v23, %v2320_v32 }
 0x536   :  { %v2325_v34 = vmul.f32 1.442695, %v2323_v33 }
 0x537   :  { %v2322_v35 = vpop.xlane.xlu0 %2321 }
 0x538   :  { %3043 = vpow2.f32 %v2325_v34  ;;  %v2324_v36 = vsub.f32 %v2316_v28, %v2322_v35 }
 0x53a   :  { %v2327_v37 = vmul.f32 1.442695, %v2324_v36 }
 0x53c   :  { %3045 = vpow2.f32 %v2327_v37 }
 0x545   :  { %v3044_v38 = vpop.eup %3043 }
 0x546   :  { %2329 = vadd.xlane.f32.xlu1 %v3044_v38 }
 0x549   :  { %v3046_v39 = vpop.eup %3045 }
 0x54a   :  { %2331 = vadd.xlane.f32.xlu1 %v3046_v39 }
 0x5cf   :  { %v2330_v40 = vpop.xlane.xlu1 %2329 }
 0x5d0   :  { %3047 = vrcp.f32 %v2330_v40 }
 0x5d3   :  { %v2332_v41 = vpop.xlane.xlu1 %2331 }
 0x5d4   :  { %3049 = vrcp.f32 %v2332_v41 }
 0x5dd   :  { %v3048_v42 = vpop.eup %3047 }
 0x5de   :  { %v2334_v43 = vmul.f32 %v3048_v42, %v3044_v38 }
 0x5e0   :  { %2337 = vst [vmem:[#allocation14] sm:$0xff] %v2334_v43 }
 0x5e1   :  { %v3050_v44 = vpop.eup %3049 }
 0x5e2   :  { %v2336_v45 = vmul.f32 %v3050_v44, %v3046_v39 }
 0x5e4   :  { %2338 = vst [vmem:[#allocation14 + $0x8] sm:$0xff] %v2336_v45 }
 0x5e5   :  { %3202 = shalt.err (!%p3199_p11)
}
 0x5e6   :  { %2350 = dma.vmem_to_hbm [thread:$0]  %s2345_s21, 256, %s3435_s11, [#allocation4], %s3229_s16, %s3229_s16, %s3230_s17  }
 0x5e7   :  { %3219 = dma.done.wait [#allocation4], 256  }
 0x5e8   :  { %3220 = vsyncadd [#allocation4], 4294967040 }
 0x5e9   :  { %2354 = vsyncpa [#allocation3], 1 }
 0x5ea   :  { %2355 = vsyncpa [#allocation6], 1 }
 0x5eb   :  { %2356 = vsyncpa [#allocation9], 1 }
 0x5ec   :  { %2357 = vsyncpa [#allocation12], 1 }
 0x5ed   :  { %2358 = vsyncpa [#allocation4], 1 }

</bundles_post_ra>
